<compile_context>
chip_gen: v6e
topology: v6e:2x2x1
jax: 0.10.0
libtpu: 0.0.40
codegen_flags: <defaults>
</compile_context>

<pallas_src>
import functools

import jax
import jax.numpy as jnp
from jax.experimental import pallas as pl
from jax.experimental.pallas import tpu as pltpu

# ---- small synthetic problem sizes (PyTorch module implies 64x64 frames; we use 16x16) ----
B = 2            # batch
CI = 3           # input channels
T = 4            # frames
H = W = 16       # spatial
CO = 16          # conv output channels per frame
HP, WP = H // 2, W // 2
KK = 9 * CI              # 27    im2col patch length per frame (ky, kx, ci)
NT = T * CO              # 64    merged channels (all frames), lane dim of conv output
TK = T * KK              # 108   block-diagonal contraction length
F_IN = T * CO * HP * WP  # 4096  fc in-features
F_OUT = 256              # fc out-features
FC_TK = 1024             # fc contraction tile: 4 pipelined K steps stream the bf16 weight


# ------------------------- Pallas kernels -------------------------

def conv_pool_kernel(p_ref, wblk_ref, cb_ref, o_ref):
    """Conv (block-diag matmul over all T frames) + bias + relu + 2x2 max-pool.

    p_ref:    (bb, 4*HP*WP, TK)  im2col patches, rows ordered (dy, dx, hp, wp),
                                 columns ordered (t, ky, kx, ci)
    wblk_ref: (TK, NT)           block-diagonal conv weights (frame t's 27x16 block)
    cb_ref:   (1, NT)            concatenated conv biases
    o_ref:    (bb, HP*WP, NT)    pooled features, row = hp*WP + wp, col = t*CO + c
    """
    bb = p_ref.shape[0]
    # One MXU matmul for the whole block: (bb*256, 108) @ (108, 64).
    y = jnp.dot(p_ref[...].reshape(bb * 4 * HP * WP, TK), wblk_ref[...],
                preferred_element_type=jnp.float32)
    y = jnp.maximum(y + cb_ref[...], 0.0)                      # bias + relu

    # Rows are (dy, dx, hp, wp): splitting the leading (sublane) dim is tile-order
    # preserving, and the 2x2 max-pool is just a max over the untiled axis of size 4 —
    # no scratch, no write-back, no strided loads.
    y = y.reshape(bb, 4, HP * WP, NT)
    o_ref[...] = jnp.max(y, axis=1).astype(o_ref.dtype)        # (bb, 64, 64) in bf16


def fc_kernel(x_ref, w_ref, b_ref, o_ref):
    """K-tiled linear layer.  The output block is VMEM-resident across the K grid axis
    (same block index every step) and doubles as the f32 accumulator.

    x_ref: (B, FC_TK)  bf16 activations (chunk k of the contraction dim)
    w_ref: (FC_TK, F_OUT) bf16 weight chunk — streamed, DMA overlaps previous chunk's MXU
    b_ref: (1, F_OUT)  f32 bias
    o_ref: (B, F_OUT)  f32 output / accumulator
    """
    k = pl.program_id(0)

    @pl.when(k == 0)
    def _():
        o_ref[...] = jnp.broadcast_to(b_ref[...], o_ref.shape)   # init with bias

    o_ref[...] += jnp.dot(x_ref[...], w_ref[...],
                          preferred_element_type=jnp.float32)     # bf16 x bf16 -> f32


# ------------------------- parameter prep (hoisted, done once) -------------------------

def prepare_params(conv_w, conv_b, fc_w, fc_b):
    """One-time repacking of the PyTorch parameters into kernel-friendly layouts."""
    # conv weights (T, O, I, 3, 3) -> per-frame matmul form (T, KK, CO) with patch order
    # (ky, kx, ci), then packed block-diagonally so all frames run as one matmul.
    wmat = jnp.transpose(conv_w, (0, 3, 4, 2, 1)).reshape(T, KK, CO)
    wblk = jnp.zeros((TK, NT), jnp.float32)
    for t in range(T):
        wblk = wblk.at[t * KK:(t + 1) * KK, t * CO:(t + 1) * CO].set(wmat[t])
    cbias = conv_b.reshape(1, NT).astype(jnp.float32)

    # FC weight: PyTorch's cat+view column order is (t, c, hp, wp); our pooled feature
    # flatten order is (hp, wp, t, c).  Permute once here and store in bf16 so the
    # dominant weight DMA is halved (MXU-native input dtype on v5e/v6e/v7x).
    wfc = (fc_w.reshape(F_OUT, T, CO, HP, WP)
               .transpose(0, 3, 4, 1, 2)
               .reshape(F_OUT, F_IN).T).astype(jnp.bfloat16)    # (F_IN, F_OUT) bf16
    bfc = fc_b.reshape(1, F_OUT).astype(jnp.float32)
    return wblk, cbias, wfc, bfc


def conv_batch_block_size():
    """Batch rows per conv block: fold the whole batch into one block on single-TC
    v5e/v6e (no grid-step overhead, one big matmul); one batch per step on dual-TC v7x
    so the "parallel" grid axis puts one batch element on each TensorCore."""
    try:
        kind = jax.devices()[0].device_kind.lower()
    except Exception:
        return B
    return 1 if "7" in kind else B


# ------------------------- forward -------------------------

@functools.partial(jax.jit, static_argnames=("bb",))
def pallas_forward(x, wblk, cbias, wfc, bfc, *, bb):
    # Glue: NCTHW -> per-frame NHWC, zero-pad, im2col.  Patch rows are emitted in
    # (dy, dx, hp, wp) order (pixel (h, w) = (2*hp+dy, 2*wp+dx)) so the in-kernel 2x2
    # max-pool is a free leading-axis max.  Columns are (t, ky, kx, ci).
    xf = jnp.transpose(x, (0, 2, 3, 4, 1))                         # (B, T, H, W, CI)
    xp = jnp.pad(xf, ((0, 0), (0, 0), (1, 1), (1, 1), (0, 0)))     # pad H, W by 1
    patches = jnp.stack([xp[:, :, ky:ky + H, kx:kx + W, :]
                         for ky in range(3) for kx in range(3)], axis=4)  # (B,T,H,W,9,CI)
    patches = patches.reshape(B, T, H, W, KK)
    patches = patches.reshape(B, T, HP, 2, WP, 2, KK)              # h=2*hp+dy, w=2*wp+dx
    p_cat = (patches.transpose(0, 3, 5, 2, 4, 1, 6)                # (B, dy, dx, hp, wp, T, KK)
                    .reshape(B, 4 * HP * WP, TK))                  # (B, 256, 108)

    nb = B // bb
    feat = pl.pallas_call(
        conv_pool_kernel,
        out_shape=jax.ShapeDtypeStruct((B, HP * WP, NT), jnp.bfloat16),
        grid_spec=pltpu.PrefetchScalarGridSpec(
            num_scalar_prefetch=0,
            grid=(nb,),                               # 1 step (v5e/v6e) or B steps (v7x)
            in_specs=[
                pl.BlockSpec((bb, 4 * HP * WP, TK), lambda i: (i, 0, 0)),
                pl.BlockSpec((TK, NT), lambda i: (0, 0)),
                pl.BlockSpec((1, NT), lambda i: (0, 0)),
            ],
            out_specs=pl.BlockSpec((bb, HP * WP, NT), lambda i: (i, 0, 0)),
        ),
        compiler_params=pltpu.CompilerParams(
            dimension_semantics=("parallel",)),
    )(p_cat, wblk, cbias)

    # Flatten order (hp, wp, t, c); wfc rows were permuted to match in prepare_params.
    feat_flat = feat.reshape(B, F_IN)                              # bf16

    out = pl.pallas_call(
        fc_kernel,
        out_shape=jax.ShapeDtypeStruct((B, F_OUT), jnp.float32),
        grid_spec=pltpu.PrefetchScalarGridSpec(
            num_scalar_prefetch=0,
            grid=(F_IN // FC_TK,),                    # K-tiled: weight streams in chunks
            in_specs=[
                pl.BlockSpec((B, FC_TK), lambda k: (0, k)),
                pl.BlockSpec((FC_TK, F_OUT), lambda k: (k, 0)),
                pl.BlockSpec((1, F_OUT), lambda k: (0, 0)),
            ],
            out_specs=pl.BlockSpec((B, F_OUT), lambda k: (0, 0)),  # resident accumulator
        ),
        compiler_params=pltpu.CompilerParams(
            dimension_semantics=("arbitrary",)),
    )(feat_flat, wfc, bfc)
    return out


# ------------------------- pure-JAX reference (mimics PyTorch exactly) -------------------------

def reference_forward(x, conv_w, conv_b, fc_w, fc_b):
    hi = jax.lax.Precision.HIGHEST
    feats = []
    for i in range(T):
        xi = x[:, :, i, :, :]                                            # (B, CI, H, W)
        yi = jax.lax.conv_general_dilated(
            xi, conv_w[i], window_strides=(1, 1), padding=((1, 1), (1, 1)),
            dimension_numbers=("NCHW", "OIHW", "NCHW"), precision=hi)
        yi = jnp.maximum(yi + conv_b[i][None, :, None, None], 0.0)       # relu(conv)
        yi = yi.reshape(B, CO, HP, 2, WP, 2).max(axis=(3, 5))            # MaxPool2d(2)
        feats.append(yi)
    merged = jnp.concatenate(feats, axis=1).reshape(B, -1)               # (t, c, hp, wp) order
    return jnp.dot(merged, fc_w.T, precision=hi) + fc_b


# ------------------------- main -------------------------

if __name__ == "__main__":
    key = jax.random.PRNGKey(0)
    k1, k2, k3, k4, k5 = jax.random.split(key, 5)

    conv_w = jax.random.normal(k1, (T, CO, CI, 3, 3), jnp.float32) * 0.1
    conv_b = jax.random.normal(k2, (T, CO), jnp.float32) * 0.1
    fc_w = jax.random.normal(k3, (F_OUT, F_IN), jnp.float32) * 0.02
    fc_b = jax.random.normal(k4, (F_OUT,), jnp.float32) * 0.1

    x = jax.random.normal(k5, (B, CI, T, H, W), jnp.float32)

    # Parameter repacking (block-diag conv weight, permuted bf16 FC weight) done once.
    params = prepare_params(conv_w, conv_b, fc_w, fc_b)
    bb = conv_batch_block_size()

    out = pallas_forward(x, *params, bb=bb)
    out = jax.block_until_ready(out)

    ref = reference_forward(x, conv_w, conv_b, fc_w, fc_b)
    assert out.shape == (B, F_OUT)
    # Tolerance loosened (per review) because the FC path uses bf16 activations/weights.
    rel_err = jnp.linalg.norm(out - ref) / jnp.linalg.norm(ref)
    assert float(rel_err) < 2e-2, f"relative error too large: {rel_err}"

    print("KERNEL_OK")
</pallas_src>

<mosaic_0001>
module attributes {stable_mosaic.version = 11 : i64} {
  func.func @conv_pool_kernel(%arg0: i32, %arg1: memref<2x256x108xf32, #tpu.memory_space<vmem>>, %arg2: memref<108x64xf32, #tpu.memory_space<vmem>>, %arg3: memref<1x64xf32, #tpu.memory_space<vmem>>, %arg4: memref<2x64x64xbf16, #tpu.memory_space<vmem>>) attributes {dimension_semantics = [#tpu.dimension_semantics<parallel>], iteration_bounds = array<i64: 1>, scalar_prefetch = 0 : i64, scratch_operands = 0 : i64, tpu.core_type = #tpu.core_type<tc>, window_params = [{transform_indices = @transform_0, window_bounds = array<i64: 2, 256, 108>}, {pipeline_mode = #tpu.pipeline_mode<synchronous>, transform_indices = @transform_1, window_bounds = array<i64: 108, 64>}, {pipeline_mode = #tpu.pipeline_mode<synchronous>, transform_indices = @transform_2, window_bounds = array<i64: 1, 64>}, {transform_indices = @transform_3, window_bounds = array<i64: 2, 64, 64>}]} {
    %c0 = arith.constant 0 : index
    %c0_0 = arith.constant 0 : index
    %c0_1 = arith.constant 0 : index
    %0 = vector.load %arg1[%c0, %c0_0, %c0_1] : memref<2x256x108xf32, #tpu.memory_space<vmem>>, vector<2x256x108xf32>
    %1 = vector.shape_cast %0 : vector<2x256x108xf32> to vector<512x108xf32>
    %c0_2 = arith.constant 0 : index
    %c0_3 = arith.constant 0 : index
    %2 = vector.load %arg2[%c0_2, %c0_3] : memref<108x64xf32, #tpu.memory_space<vmem>>, vector<108x64xf32>
    %cst = arith.constant dense<0.000000e+00> : vector<512x64xf32>
    %3 = tpu.matmul %1, %2, %cst {dimension_numbers = #tpu.dot_dimension_numbers<[1], [0], [0], [1], [0, 0, 1, 1], [], []>} : vector<512x108xf32>, vector<108x64xf32>, vector<512x64xf32> -> vector<512x64xf32>
    %c0_4 = arith.constant 0 : index
    %c0_5 = arith.constant 0 : index
    %4 = vector.load %arg3[%c0_4, %c0_5] : memref<1x64xf32, #tpu.memory_space<vmem>>, vector<1x64xf32>
    %5 = vector.broadcast %4 : vector<1x64xf32> to vector<512x64xf32>
    %6 = arith.addf %3, %5 : vector<512x64xf32>
    %cst_6 = arith.constant 0.000000e+00 : f32
    %7 = vector.broadcast %cst_6 : f32 to vector<512x64xf32>
    %8 = arith.maximumf %6, %7 : vector<512x64xf32>
    %9 = vector.shape_cast %8 : vector<512x64xf32> to vector<2x4x64x64xf32>
    %cst_7 = arith.constant dense<0xFF800000> : vector<2x64x64xf32>
    %10 = vector.multi_reduction <maximumf>, %9, %cst_7 [1] : vector<2x4x64x64xf32> to vector<2x64x64xf32>
    %11 = arith.truncf %10 : vector<2x64x64xf32> to vector<2x64x64xbf16>
    %c0_8 = arith.constant 0 : index
    %c0_9 = arith.constant 0 : index
    %c0_10 = arith.constant 0 : index
    %12 = vector.load %arg4[%c0_8, %c0_9, %c0_10] : memref<2x64x64xbf16, #tpu.memory_space<vmem>>, vector<2x64x64xbf16>
    tpu.vector_store %arg4[%c0_8, %c0_9, %c0_10], %11 {strides = array<i32>} : memref<2x64x64xbf16, #tpu.memory_space<vmem>>, vector<2x64x64xbf16>,
    return
  }
  func.func @transform_0(%arg0: i32) -> (i32, i32, i32) {
    %c0_i32 = arith.constant 0 : i32
    %c0_i32_0 = arith.constant 0 : i32
    %c0_i32_1 = arith.constant 0 : i32
    return %arg0, %c0_i32, %c0_i32_0 : i32, i32, i32
  }
  func.func @transform_1(%arg0: i32) -> (i32, i32) {
    %c0_i32 = arith.constant 0 : i32
    %c0_i32_0 = arith.constant 0 : i32
    %c0_i32_1 = arith.constant 0 : i32
    return %c0_i32, %c0_i32_0 : i32, i32
  }
  func.func @transform_2(%arg0: i32) -> (i32, i32) {
    %c0_i32 = arith.constant 0 : i32
    %c0_i32_0 = arith.constant 0 : i32
    %c0_i32_1 = arith.constant 0 : i32
    return %c0_i32, %c0_i32_0 : i32, i32
  }
  func.func @transform_3(%arg0: i32) -> (i32, i32, i32) {
    %c0_i32 = arith.constant 0 : i32
    %c0_i32_0 = arith.constant 0 : i32
    %c0_i32_1 = arith.constant 0 : i32
    return %arg0, %c0_i32, %c0_i32_0 : i32, i32, i32
  }
}

module attributes {stable_mosaic.version = 11 : i64} {
  func.func @fc_kernel(%arg0: i32, %arg1: memref<2x1024xbf16, #tpu.memory_space<vmem>>, %arg2: memref<1024x256xbf16, #tpu.memory_space<vmem>>, %arg3: memref<1x256xf32, #tpu.memory_space<vmem>>, %arg4: memref<2x256xf32, #tpu.memory_space<vmem>>) attributes {dimension_semantics = [#tpu.dimension_semantics<arbitrary>], iteration_bounds = array<i64: 4>, scalar_prefetch = 0 : i64, scratch_operands = 0 : i64, tpu.core_type = #tpu.core_type<tc>, window_params = [{transform_indices = @transform_0, window_bounds = array<i64: 2, 1024>}, {transform_indices = @transform_1, window_bounds = array<i64: 1024, 256>}, {pipeline_mode = #tpu.pipeline_mode<synchronous>, transform_indices = @transform_2, window_bounds = array<i64: 1, 256>}, {pipeline_mode = #tpu.pipeline_mode<synchronous>, transform_indices = @transform_3, window_bounds = array<i64: 2, 256>}]} {
    %c0_i32 = arith.constant 0 : i32
    %0 = arith.cmpi eq, %arg0, %c0_i32 : i32
    %1 = arith.extui %0 : i1 to i32
    %c0_i32_0 = arith.constant 0 : i32
    %2 = arith.cmpi ne, %1, %c0_i32_0 : i32
    scf.if %2 {
      %c0_8 = arith.constant 0 : index
      %c0_9 = arith.constant 0 : index
      %9 = vector.load %arg3[%c0_8, %c0_9] : memref<1x256xf32, #tpu.memory_space<vmem>>, vector<1x256xf32>
      %10 = vector.shape_cast %9 : vector<1x256xf32> to vector<1x256xf32>
      %11 = vector.broadcast %10 : vector<1x256xf32> to vector<2x256xf32>
      %c0_10 = arith.constant 0 : index
      %c0_11 = arith.constant 0 : index
      %12 = vector.load %arg4[%c0_10, %c0_11] : memref<2x256xf32, #tpu.memory_space<vmem>>, vector<2x256xf32>
      tpu.vector_store %arg4[%c0_10, %c0_11], %11 {strides = array<i32>} : memref<2x256xf32, #tpu.memory_space<vmem>>, vector<2x256xf32>,
    } else {
    }
    %c0 = arith.constant 0 : index
    %c0_1 = arith.constant 0 : index
    %3 = vector.load %arg4[%c0, %c0_1] : memref<2x256xf32, #tpu.memory_space<vmem>>, vector<2x256xf32>
    %c0_2 = arith.constant 0 : index
    %c0_3 = arith.constant 0 : index
    %4 = vector.load %arg1[%c0_2, %c0_3] : memref<2x1024xbf16, #tpu.memory_space<vmem>>, vector<2x1024xbf16>
    %c0_4 = arith.constant 0 : index
    %c0_5 = arith.constant 0 : index
    %5 = vector.load %arg2[%c0_4, %c0_5] : memref<1024x256xbf16, #tpu.memory_space<vmem>>, vector<1024x256xbf16>
    %cst = arith.constant dense<0.000000e+00> : vector<2x256xf32>
    %6 = tpu.matmul %4, %5, %cst {dimension_numbers = #tpu.dot_dimension_numbers<[1], [0], [0], [1], [0, 0, 1, 1], [], []>} : vector<2x1024xbf16>, vector<1024x256xbf16>, vector<2x256xf32> -> vector<2x256xf32>
    %7 = arith.addf %3, %6 : vector<2x256xf32>
    %c0_6 = arith.constant 0 : index
    %c0_7 = arith.constant 0 : index
    %8 = vector.load %arg4[%c0_6, %c0_7] : memref<2x256xf32, #tpu.memory_space<vmem>>, vector<2x256xf32>
    tpu.vector_store %arg4[%c0_6, %c0_7], %7 {strides = array<i32>} : memref<2x256xf32, #tpu.memory_space<vmem>>, vector<2x256xf32>,
    return
  }
  func.func @transform_0(%arg0: i32) -> (i32, i32) {
    %c0_i32 = arith.constant 0 : i32
    %c0_i32_0 = arith.constant 0 : i32
    return %c0_i32, %arg0 : i32, i32
  }
  func.func @transform_1(%arg0: i32) -> (i32, i32) {
    %c0_i32 = arith.constant 0 : i32
    %c0_i32_0 = arith.constant 0 : i32
    return %arg0, %c0_i32 : i32, i32
  }
  func.func @transform_2(%arg0: i32) -> (i32, i32) {
    %c0_i32 = arith.constant 0 : i32
    %c0_i32_0 = arith.constant 0 : i32
    %c0_i32_1 = arith.constant 0 : i32
    return %c0_i32, %c0_i32_0 : i32, i32
  }
  func.func @transform_3(%arg0: i32) -> (i32, i32) {
    %c0_i32 = arith.constant 0 : i32
    %c0_i32_0 = arith.constant 0 : i32
    %c0_i32_1 = arith.constant 0 : i32
    return %c0_i32, %c0_i32_0 : i32, i32
  }
}

</mosaic_0001>

<bundles_post_ra>
// kernel: pallas_forward.2
= control target key start
LH: loop header
LB: loop body
LE: loop exit
PB: predicated region body
PF: predicated region fallthrough
CT: control target
= control target key end

     0   :  { %vm292_vm0 = vcmask 1043456   ;;  %vm99_vm1 = vcmask 883712   ;;  %vm745_vm2 = vcmask 523264   ;;  %vm922_vm3 = vcmask 519168   ;;  %s1978_s1 = inlined_call_operand.vmem [shape: f32[108,64], index: 1, kind: input, shape index: {}]   ;;  %s1979_s0 = inlined_call_operand.vmem [shape: f32[2,256,108], index: 0, kind: input, shape index: {}]   ;;  %s1980_s2 = inlined_call_operand.vmem [shape: f32[1,64], index: 2, kind: input, shape index: {}]   ;;  %s1981_s3 = inlined_call_operand.vmem [shape: bf16[2,64,64], index: 3, kind: output, shape index: {}]  }
   0x1   :  { %v91_v0 = vld [vmem:[%s1978_s1 + $0x68] sm:$0xf]  ;;  %v90_v1 = vld [vmem:[%s1978_s1 + $0x60] sm:$0xff]  ;;  %v89_v2 = vld [vmem:[%s1978_s1 + $0x58] sm:$0xff] }
   0x2   :  { %1119 = vmatprep.subr.msk.mxu0 %vm292_vm0, %v91_v0  ;;  %1243 = vmatprep.subr.msk.mxu1 %vm292_vm0, %v91_v0  ;;  %v88_v3 = vld [vmem:[%s1978_s1 + $0x50] sm:$0xff]  ;;  %v87_v4 = vld [vmem:[%s1978_s1 + $0x48] sm:$0xff]  ;;  %v86_v5 = vld [vmem:[%s1978_s1 + $0x40] sm:$0xff] }
   0x3   :  { %1120 = vmatpush3.msk.msra.mxu0 %vm292_vm0, %v91_v0  ;;  %1257 = vmatpush3.msk.msra.mxu1 %vm292_vm0, %v91_v0  ;;  %v85_v6 = vld [vmem:[%s1978_s1 + $0x38] sm:$0xff]  ;;  %v84_v7 = vld [vmem:[%s1978_s1 + $0x30] sm:$0xff]  ;;  %v83_v8 = vld [vmem:[%s1978_s1 + $0x28] sm:$0xff] }
   0x4   :  { %1121 = vmatprep.subr.mxu0 %v90_v1  ;;  %1244 = vmatprep.subr.mxu1 %v90_v1  ;;  %v82_v9 = vld [vmem:[%s1978_s1 + $0x20] sm:$0xff]  ;;  %v81_v10 = vld [vmem:[%s1978_s1 + $0x18] sm:$0xff]  ;;  %v80_v11 = vld [vmem:[%s1978_s1 + $0x10] sm:$0xff] }
   0x5   :  { %1122 = vmatpush3.msra.mxu0 %v90_v1  ;;  %1258 = vmatpush3.msra.mxu1 %v90_v1  ;;  %v79_v12 = vld [vmem:[%s1978_s1 + $0x8] sm:$0xff]  ;;  %v78_v13 = vld [vmem:[%s1978_s1] sm:$0xff]  ;;  %v16_v18 = vld [vmem:[%s1979_s0 + $0x10] sm:$0xff] }
   0x6   :  { %1123 = vmatprep.subr.mxu0 %v89_v2  ;;  %1245 = vmatprep.subr.mxu1 %v89_v2  ;;  %v14_v14 = vld [vmem:[%s1979_s0] sm:$0xff]  ;;  %v15_v16 = vld [vmem:[%s1979_s0 + $0x8] sm:$0xff]  ;;  %v48_v19 = vld [vmem:[%s1979_s0 + $0x110] sm:$0xff] }
   0x7   :  { %1124 = vmatpush3.msra.mxu0 %v89_v2  ;;  %1259 = vmatpush3.msra.mxu1 %v89_v2  ;;  %v46_v15 = vld [vmem:[%s1979_s0 + $0x100] sm:$0xff]  ;;  %v47_v17 = vld [vmem:[%s1979_s0 + $0x108] sm:$0xff]  ;;  %v17_v20 = vld [vmem:[%s1979_s0 + $0x18] sm:$0xff] }
   0x8   :  { %1125 = vmatprep.subr.mxu0 %v88_v3  ;;  %1246 = vmatprep.subr.mxu1 %v88_v3  ;;  %v49_v21 = vld [vmem:[%s1979_s0 + $0x118] sm:$0xff]  ;;  %v18_v22 = vld [vmem:[%s1979_s0 + $0x20] sm:$0xff]  ;;  %v19_v24 = vld [vmem:[%s1979_s0 + $0x28] sm:$0xff] }
   0x9   :  { %1126 = vmatpush3.msra.mxu0 %v88_v3  ;;  %1260 = vmatpush3.msra.mxu1 %v88_v3  ;;  %v50_v23 = vld [vmem:[%s1979_s0 + $0x120] sm:$0xff]  ;;  %v51_v25 = vld [vmem:[%s1979_s0 + $0x128] sm:$0xff]  ;;  %v20_v26 = vld [vmem:[%s1979_s0 + $0x30] sm:$0xff] }
   0xa   :  { %1127 = vmatprep.subr.mxu0 %v87_v4  ;;  %1247 = vmatprep.subr.mxu1 %v87_v4  ;;  %v52_v27 = vld [vmem:[%s1979_s0 + $0x130] sm:$0xff]  ;;  %v21_v28 = vld [vmem:[%s1979_s0 + $0x38] sm:$0xff]  ;;  %v22_v30 = vld [vmem:[%s1979_s0 + $0x40] sm:$0xff] }
   0xb   :  { %1128 = vmatpush3.msra.mxu0 %v87_v4  ;;  %1261 = vmatpush3.msra.mxu1 %v87_v4  ;;  %v53_v29 = vld [vmem:[%s1979_s0 + $0x138] sm:$0xff]  ;;  %v54_v31 = vld [vmem:[%s1979_s0 + $0x140] sm:$0xff]  ;;  %v23_v32 = vld [vmem:[%s1979_s0 + $0x48] sm:$0xff] }
   0xc   :  { %1129 = vmatprep.subr.mxu0 %v86_v5  ;;  %1248 = vmatprep.subr.mxu1 %v86_v5  ;;  %v55_v33 = vld [vmem:[%s1979_s0 + $0x148] sm:$0xff]  ;;  %v24_v34 = vld [vmem:[%s1979_s0 + $0x50] sm:$0xff]  ;;  %v25_v36 = vld [vmem:[%s1979_s0 + $0x58] sm:$0xff] }
   0xd   :  { %1130 = vmatpush3.msra.mxu0 %v86_v5  ;;  %1262 = vmatpush3.msra.mxu1 %v86_v5  ;;  %v56_v35 = vld [vmem:[%s1979_s0 + $0x150] sm:$0xff]  ;;  %v57_v37 = vld [vmem:[%s1979_s0 + $0x158] sm:$0xff]  ;;  %v26_v38 = vld [vmem:[%s1979_s0 + $0x60] sm:$0xff] }
   0xe   :  { %1131 = vmatprep.subr.mxu0 %v85_v6  ;;  %1249 = vmatprep.subr.mxu1 %v85_v6  ;;  %v58_v39 = vld [vmem:[%s1979_s0 + $0x160] sm:$0xff]  ;;  %v27_v40 = vld [vmem:[%s1979_s0 + $0x68] sm:$0xff]  ;;  %v28_v42 = vld [vmem:[%s1979_s0 + $0x70] sm:$0xff] }
   0xf   :  { %1132 = vmatpush3.msra.mxu0 %v85_v6  ;;  %1263 = vmatpush3.msra.mxu1 %v85_v6  ;;  %v59_v41 = vld [vmem:[%s1979_s0 + $0x168] sm:$0xff]  ;;  %v60_v43 = vld [vmem:[%s1979_s0 + $0x170] sm:$0xff]  ;;  %v29_v44 = vld [vmem:[%s1979_s0 + $0x78] sm:$0xff] }
  0x10   :  { %1133 = vmatprep.subr.mxu0 %v84_v7  ;;  %1250 = vmatprep.subr.mxu1 %v84_v7  ;;  %v61_v45 = vld [vmem:[%s1979_s0 + $0x178] sm:$0xff]  ;;  %v30_v46 = vld [vmem:[%s1979_s0 + $0x80] sm:$0xff]  ;;  %v31_v48 = vld [vmem:[%s1979_s0 + $0x88] sm:$0xff] }
  0x11   :  { %1134 = vmatpush3.msra.mxu0 %v84_v7  ;;  %1264 = vmatpush3.msra.mxu1 %v84_v7  ;;  %v62_v47 = vld [vmem:[%s1979_s0 + $0x180] sm:$0xff]  ;;  %v63_v49 = vld [vmem:[%s1979_s0 + $0x188] sm:$0xff]  ;;  %v32_v50 = vld [vmem:[%s1979_s0 + $0x90] sm:$0xff] }
  0x12   :  { %1135 = vmatprep.subr.mxu0 %v83_v8  ;;  %1251 = vmatprep.subr.mxu1 %v83_v8  ;;  %v64_v51 = vld [vmem:[%s1979_s0 + $0x190] sm:$0xff]  ;;  %v33_v52 = vld [vmem:[%s1979_s0 + $0x98] sm:$0xff]  ;;  %v34_v54 = vld [vmem:[%s1979_s0 + $0xa0] sm:$0xff] }
  0x13   :  { %1136 = vmatpush3.msra.mxu0 %v83_v8  ;;  %1265 = vmatpush3.msra.mxu1 %v83_v8  ;;  %v65_v53 = vld [vmem:[%s1979_s0 + $0x198] sm:$0xff]  ;;  %v66_v55 = vld [vmem:[%s1979_s0 + $0x1a0] sm:$0xff]  ;;  %v35_v56 = vld [vmem:[%s1979_s0 + $0xa8] sm:$0xff] }
  0x14   :  { %1137 = vmatprep.subr.mxu0 %v82_v9  ;;  %1252 = vmatprep.subr.mxu1 %v82_v9  ;;  %v67_v57 = vld [vmem:[%s1979_s0 + $0x1a8] sm:$0xff]  ;;  %v36_v58 = vld [vmem:[%s1979_s0 + $0xb0] sm:$0xff]  ;;  %v37_v60 = vld [vmem:[%s1979_s0 + $0xb8] sm:$0xff] }
  0x15   :  { %1138 = vmatpush3.msra.mxu0 %v82_v9  ;;  %1266 = vmatpush3.msra.mxu1 %v82_v9  ;;  %v68_v59 = vld [vmem:[%s1979_s0 + $0x1b0] sm:$0xff]  ;;  %v69_v61 = vld [vmem:[%s1979_s0 + $0x1b8] sm:$0xff]  ;;  %v38_v62 = vld [vmem:[%s1979_s0 + $0xc0] sm:$0xff] }
  0x16   :  { %1139 = vmatprep.subr.mxu0 %v81_v10  ;;  %1253 = vmatprep.subr.mxu1 %v81_v10  ;;  %v70_v63 = vld [vmem:[%s1979_s0 + $0x1c0] sm:$0xff]  ;;  %v39_v0 = vld [vmem:[%s1979_s0 + $0xc8] sm:$0xff]  ;;  %v40_v2 = vld [vmem:[%s1979_s0 + $0xd0] sm:$0xff] }
  0x17   :  { %1140 = vmatpush3.msra.mxu0 %v81_v10  ;;  %1267 = vmatpush3.msra.mxu1 %v81_v10  ;;  %v71_v1 = vld [vmem:[%s1979_s0 + $0x1c8] sm:$0xff]  ;;  %v72_v3 = vld [vmem:[%s1979_s0 + $0x1d0] sm:$0xff]  ;;  %v41_v4 = vld [vmem:[%s1979_s0 + $0xd8] sm:$0xff] }
  0x18   :  { %1141 = vmatprep.subr.mxu0 %v80_v11  ;;  %1254 = vmatprep.subr.mxu1 %v80_v11  ;;  %v73_v5 = vld [vmem:[%s1979_s0 + $0x1d8] sm:$0xff]  ;;  %v42_v6 = vld [vmem:[%s1979_s0 + $0xe0] sm:$0xff]  ;;  %v43_v8 = vld [vmem:[%s1979_s0 + $0xe8] sm:$0xff] }
  0x19   :  { %1142 = vmatpush3.msra.mxu0 %v80_v11  ;;  %1268 = vmatpush3.msra.mxu1 %v80_v11  ;;  %v74_v7 = vld [vmem:[%s1979_s0 + $0x1e0] sm:$0xff]  ;;  %v75_v9 = vld [vmem:[%s1979_s0 + $0x1e8] sm:$0xff]  ;;  %v44_v10 = vld [vmem:[%s1979_s0 + $0xf0] sm:$0xff] }
  0x1a   :  { %1143 = vmatprep.subr.mxu0 %v79_v12  ;;  %1255 = vmatprep.subr.mxu1 %v79_v12  ;;  %v76_v11 = vld [vmem:[%s1979_s0 + $0x1f0] sm:$0xff] }
  0x1b   :  { %1144 = vmatpush3.msra.mxu0 %v79_v12  ;;  %1269 = vmatpush3.msra.mxu1 %v79_v12  ;;  %v45_v12 = vld [vmem:[%s1979_s0 + $0xf8] sm:$0xff] }
  0x1c   :  { %1145 = vmatprep.subr.mxu0 %v78_v13  ;;  %1256 = vmatprep.subr.mxu1 %v78_v13 }
  0x1d   :  { %1146 = vmatpush3.msra.mxu0 %v78_v13  ;;  %1270 = vmatpush3.msra.mxu1 %v78_v13  ;;  %v77_v13 = vld [vmem:[%s1979_s0 + $0x1f8] sm:$0xff] }
  0x1e   :  { %1147 = vmatprep.mubr.msk.f32.mxu0 %vm99_vm1, %v14_v14  ;;  %1195 = vmatprep.mubr.msk.f32.mxu1 %vm99_vm1, %v46_v15 }
  0x1f   :  { %1148 = vmatmul.mubr.msk.f32.vlgmr.msra.gmra.mxu0 %vm99_vm1, %v15_v16  ;;  %1196 = vmatmul.mubr.msk.f32.vlgmr.msra.gmra.mxu1 %vm99_vm1, %v47_v17 }
  0x20   :  { %1150 = vmatprep.mubr.msk.f32.mxu0 %vm99_vm1, %v16_v18  ;;  %1198 = vmatprep.mubr.msk.f32.mxu1 %vm99_vm1, %v48_v19  ;;  %v1592_v18 = vld [vmem:[%s1980_s2] ss:$0 sm:$0xff] }
  0x23   :  { %1151 = vmatmul.mubr.msk.f32.gmra.mxu0 %vm99_vm1, %v17_v20  ;;  %1199 = vmatmul.mubr.msk.f32.gmra.mxu1 %vm99_vm1, %v49_v21 }
  0x24   :  { %1153 = vmatprep.mubr.msk.f32.mxu0 %vm99_vm1, %v18_v22  ;;  %1201 = vmatprep.mubr.msk.f32.mxu1 %vm99_vm1, %v50_v23 }
  0x27   :  { %1154 = vmatmul.mubr.msk.f32.gmra.mxu0 %vm99_vm1, %v19_v24  ;;  %1202 = vmatmul.mubr.msk.f32.gmra.mxu1 %vm99_vm1, %v51_v25 }
  0x28   :  { %1156 = vmatprep.mubr.msk.f32.mxu0 %vm99_vm1, %v20_v26  ;;  %1204 = vmatprep.mubr.msk.f32.mxu1 %vm99_vm1, %v52_v27 }
  0x2b   :  { %1157 = vmatmul.mubr.msk.f32.gmra.mxu0 %vm99_vm1, %v21_v28  ;;  %1205 = vmatmul.mubr.msk.f32.gmra.mxu1 %vm99_vm1, %v53_v29 }
  0x2c   :  { %1159 = vmatprep.mubr.msk.f32.mxu0 %vm99_vm1, %v22_v30  ;;  %1207 = vmatprep.mubr.msk.f32.mxu1 %vm99_vm1, %v54_v31 }
  0x2f   :  { %1160 = vmatmul.mubr.msk.f32.gmra.mxu0 %vm99_vm1, %v23_v32  ;;  %1208 = vmatmul.mubr.msk.f32.gmra.mxu1 %vm99_vm1, %v55_v33 }
  0x30   :  { %1162 = vmatprep.mubr.msk.f32.mxu0 %vm99_vm1, %v24_v34  ;;  %1210 = vmatprep.mubr.msk.f32.mxu1 %vm99_vm1, %v56_v35 }
  0x33   :  { %1163 = vmatmul.mubr.msk.f32.gmra.mxu0 %vm99_vm1, %v25_v36  ;;  %1211 = vmatmul.mubr.msk.f32.gmra.mxu1 %vm99_vm1, %v57_v37 }
  0x34   :  { %1165 = vmatprep.mubr.msk.f32.mxu0 %vm99_vm1, %v26_v38  ;;  %1213 = vmatprep.mubr.msk.f32.mxu1 %vm99_vm1, %v58_v39 }
  0x37   :  { %1166 = vmatmul.mubr.msk.f32.gmra.mxu0 %vm99_vm1, %v27_v40  ;;  %1214 = vmatmul.mubr.msk.f32.gmra.mxu1 %vm99_vm1, %v59_v41 }
  0x38   :  { %1168 = vmatprep.mubr.msk.f32.mxu0 %vm99_vm1, %v28_v42  ;;  %1216 = vmatprep.mubr.msk.f32.mxu1 %vm99_vm1, %v60_v43 }
  0x3b   :  { %1169 = vmatmul.mubr.msk.f32.gmra.mxu0 %vm99_vm1, %v29_v44  ;;  %1217 = vmatmul.mubr.msk.f32.gmra.mxu1 %vm99_vm1, %v61_v45 }
  0x3c   :  { %1171 = vmatprep.mubr.msk.f32.mxu0 %vm99_vm1, %v30_v46  ;;  %1219 = vmatprep.mubr.msk.f32.mxu1 %vm99_vm1, %v62_v47 }
  0x3f   :  { %1172 = vmatmul.mubr.msk.f32.gmra.mxu0 %vm99_vm1, %v31_v48  ;;  %1220 = vmatmul.mubr.msk.f32.gmra.mxu1 %vm99_vm1, %v63_v49 }
  0x40   :  { %1174 = vmatprep.mubr.msk.f32.mxu0 %vm99_vm1, %v32_v50  ;;  %1222 = vmatprep.mubr.msk.f32.mxu1 %vm99_vm1, %v64_v51 }
  0x43   :  { %1175 = vmatmul.mubr.msk.f32.gmra.mxu0 %vm99_vm1, %v33_v52  ;;  %1223 = vmatmul.mubr.msk.f32.gmra.mxu1 %vm99_vm1, %v65_v53 }
  0x44   :  { %1177 = vmatprep.mubr.msk.f32.mxu0 %vm99_vm1, %v34_v54  ;;  %1225 = vmatprep.mubr.msk.f32.mxu1 %vm99_vm1, %v66_v55 }
  0x47   :  { %1178 = vmatmul.mubr.msk.f32.gmra.mxu0 %vm99_vm1, %v35_v56  ;;  %1226 = vmatmul.mubr.msk.f32.gmra.mxu1 %vm99_vm1, %v67_v57 }
  0x48   :  { %1180 = vmatprep.mubr.msk.f32.mxu0 %vm99_vm1, %v36_v58  ;;  %1228 = vmatprep.mubr.msk.f32.mxu1 %vm99_vm1, %v68_v59 }
  0x4b   :  { %1181 = vmatmul.mubr.msk.f32.gmra.mxu0 %vm99_vm1, %v37_v60  ;;  %1229 = vmatmul.mubr.msk.f32.gmra.mxu1 %vm99_vm1, %v69_v61 }
  0x4c   :  { %1183 = vmatprep.mubr.msk.f32.mxu0 %vm99_vm1, %v38_v62  ;;  %1231 = vmatprep.mubr.msk.f32.mxu1 %vm99_vm1, %v70_v63 }
  0x4f   :  { %1184 = vmatmul.mubr.msk.f32.gmra.mxu0 %vm99_vm1, %v39_v0  ;;  %1232 = vmatmul.mubr.msk.f32.gmra.mxu1 %vm99_vm1, %v71_v1 }
  0x50   :  { %1186 = vmatprep.mubr.msk.f32.mxu0 %vm99_vm1, %v40_v2  ;;  %1234 = vmatprep.mubr.msk.f32.mxu1 %vm99_vm1, %v72_v3 }
  0x53   :  { %1187 = vmatmul.mubr.msk.f32.gmra.mxu0 %vm99_vm1, %v41_v4  ;;  %1235 = vmatmul.mubr.msk.f32.gmra.mxu1 %vm99_vm1, %v73_v5 }
  0x54   :  { %1189 = vmatprep.mubr.msk.f32.mxu0 %vm99_vm1, %v42_v6  ;;  %1237 = vmatprep.mubr.msk.f32.mxu1 %vm99_vm1, %v74_v7 }
  0x57   :  { %1190 = vmatmul.mubr.msk.f32.gmra.mxu0 %vm99_vm1, %v43_v8  ;;  %1238 = vmatmul.mubr.msk.f32.gmra.mxu1 %vm99_vm1, %v75_v9 }
  0x58   :  { %1192 = vmatprep.mubr.msk.f32.mxu0 %vm99_vm1, %v44_v10  ;;  %1240 = vmatprep.mubr.msk.f32.mxu1 %vm99_vm1, %v76_v11 }
  0x5b   :  { %1193 = vmatmul.mubr.msk.f32.gmra.mxu0 %vm99_vm1, %v45_v12  ;;  %1241 = vmatmul.mubr.msk.f32.gmra.mxu1 %vm99_vm1, %v77_v13 }
  0xdf   :  { %v1149_v14 = vpop.f32.mrf.mxu0  ;;  %v1197_v15 = vpop.f32.mrf.mxu1 }
  0xe0   :  { %v368_v21 = vadd.f32 %v1149_v14, %v1592_v18  ;;  %v528_v22 = vadd.f32 %v1197_v15, %v1592_v18 }
  0xe1   :  { %v362_v16 = vpop.f32.mrf.mxu0  ;;  %v522_v17 = vpop.f32.mrf.mxu1 }
  0xe2   :  { %v363_v25 = vadd.f32 %v1592_v18, %v362_v16  ;;  %v523_v26 = vadd.f32 %v1592_v18, %v522_v17  ;;  %v682_v33 = vmax.f32 %v368_v21, 0.0  ;;  %v714_v34 = vmax.f32 %v528_v22, 0.0 }
  0xe3   :  { %v1152_v19 = vpop.f32.mrf.mxu0  ;;  %v1200_v20 = vpop.f32.mrf.mxu1 }
  0xe4   :  { %v378_v27 = vadd.f32 %v1152_v19, %v1592_v18  ;;  %v538_v28 = vadd.f32 %v1200_v20, %v1592_v18  ;;  %v681_v37 = vmax.f32 %v363_v25, 0.0  ;;  %v713_v38 = vmax.f32 %v523_v26, 0.0 }
  0xe5   :  { %v372_v23 = vpop.f32.mrf.mxu0  ;;  %v532_v24 = vpop.f32.mrf.mxu1  ;;  %v1607_v49 = vsel %vm745_vm2, %v682_v33, -inf  ;;  %v1610_v50 = vsel %vm745_vm2, %v714_v34, -inf }
  0xe6   :  { %v373_v31 = vadd.f32 %v1592_v18, %v372_v23  ;;  %v533_v32 = vadd.f32 %v1592_v18, %v532_v24  ;;  %v684_v41 = vmax.f32 %v378_v27, 0.0  ;;  %v716_v42 = vmax.f32 %v538_v28, 0.0 }
  0xe7   :  { %v1155_v29 = vpop.f32.mrf.mxu0  ;;  %v1203_v30 = vpop.f32.mrf.mxu1  ;;  %v1615_v55 = vsel %vm745_vm2, %v681_v37, -inf  ;;  %v1618_v56 = vsel %vm745_vm2, %v713_v38, -inf }
  0xe8   :  { %v388_v39 = vadd.f32 %v1155_v29, %v1592_v18  ;;  %v548_v40 = vadd.f32 %v1203_v30, %v1592_v18  ;;  %v683_v45 = vmax.f32 %v373_v31, 0.0  ;;  %v715_v46 = vmax.f32 %v533_v32, 0.0 }
  0xe9   :  { %v382_v35 = vpop.f32.mrf.mxu0  ;;  %v542_v36 = vpop.f32.mrf.mxu1  ;;  %v1621_v59 = vsel %vm745_vm2, %v684_v41, -inf  ;;  %v1624_v60 = vsel %vm745_vm2, %v716_v42, -inf }
  0xea   :  { %v383_v47 = vadd.f32 %v1592_v18, %v382_v35  ;;  %v543_v48 = vadd.f32 %v1592_v18, %v542_v36  ;;  %v686_v57 = vmax.f32 %v388_v39, 0.0  ;;  %v718_v58 = vmax.f32 %v548_v40, 0.0 }
  0xeb   :  { %v1158_v43 = vpop.f32.mrf.mxu0  ;;  %v1206_v44 = vpop.f32.mrf.mxu1  ;;  %v1629_v1 = vsel %vm745_vm2, %v683_v45, -inf  ;;  %v1632_v2 = vsel %vm745_vm2, %v715_v46, -inf }
  0xec   :  { %v398_v51 = vadd.f32 %v1158_v43, %v1592_v18  ;;  %v558_v52 = vadd.f32 %v1206_v44, %v1592_v18  ;;  %v685_v3 = vmax.f32 %v383_v47, 0.0  ;;  %v717_v4 = vmax.f32 %v543_v48, 0.0 }
  0xed   :  { %v392_v53 = vpop.f32.mrf.mxu0  ;;  %v552_v54 = vpop.f32.mrf.mxu1  ;;  %v1637_v11 = vsel %vm745_vm2, %v686_v57, -inf  ;;  %v1640_v12 = vsel %vm745_vm2, %v718_v58, -inf }
  0xee   :  { %v393_v61 = vadd.f32 %v1592_v18, %v392_v53  ;;  %v553_v62 = vadd.f32 %v1592_v18, %v552_v54  ;;  %v688_v5 = vmax.f32 %v398_v51, 0.0  ;;  %v720_v6 = vmax.f32 %v558_v52, 0.0 }
  0xef   :  { %v1161_v63 = vpop.f32.mrf.mxu0  ;;  %v1209_v0 = vpop.f32.mrf.mxu1  ;;  %v1647_v26 = vsel %vm745_vm2, %v685_v3, -inf  ;;  %v1650_v27 = vsel %vm745_vm2, %v717_v4, -inf }
  0xf0   :  { %v408_v7 = vadd.f32 %v1161_v63, %v1592_v18  ;;  %v568_v8 = vadd.f32 %v1209_v0, %v1592_v18  ;;  %v687_v15 = vmax.f32 %v393_v61, 0.0  ;;  %v719_v16 = vmax.f32 %v553_v62, 0.0 }
  0xf1   :  { %v402_v9 = vpop.f32.mrf.mxu0  ;;  %v562_v10 = vpop.f32.mrf.mxu1  ;;  %v1653_v28 = vsel %vm745_vm2, %v688_v5, -inf  ;;  %v1656_v29 = vsel %vm745_vm2, %v720_v6, -inf }
  0xf2   :  { %v403_v13 = vadd.f32 %v1592_v18, %v402_v9  ;;  %v563_v14 = vadd.f32 %v1592_v18, %v562_v10  ;;  %v690_v17 = vmax.f32 %v408_v7, 0.0  ;;  %v722_v19 = vmax.f32 %v568_v8, 0.0 }
  0xf3   :  { %v1164_v20 = vpop.f32.mrf.mxu0  ;;  %v1212_v21 = vpop.f32.mrf.mxu1  ;;  %v1671_v36 = vsel %vm745_vm2, %v687_v15, -inf  ;;  %v1674_v37 = vsel %vm745_vm2, %v719_v16, -inf }
  0xf4   :  { %v689_v22 = vmax.f32 %v403_v13, 0.0  ;;  %v721_v23 = vmax.f32 %v563_v14, 0.0  ;;  %v418_v24 = vadd.f32 %v1164_v20, %v1592_v18  ;;  %v578_v25 = vadd.f32 %v1212_v21, %v1592_v18 }
  0xf5   :  { %v412_v30 = vpop.f32.mrf.mxu0  ;;  %v572_v31 = vpop.f32.mrf.mxu1  ;;  %v1659_v32 = vsel %vm745_vm2, %v690_v17, -inf  ;;  %v1662_v33 = vsel %vm745_vm2, %v722_v19, -inf }
  0xf6   :  { %v1665_v34 = vsel %vm745_vm2, %v689_v22, -inf  ;;  %v1668_v35 = vsel %vm745_vm2, %v721_v23, -inf  ;;  %v692_v38 = vmax.f32 %v418_v24, 0.0  ;;  %v724_v39 = vmax.f32 %v578_v25, 0.0 }
  0xf7   :  { %v1167_v40 = vpop.f32.mrf.mxu0  ;;  %v1215_v41 = vpop.f32.mrf.mxu1  ;;  %v413_v42 = vadd.f32 %v1592_v18, %v412_v30  ;;  %v573_v43 = vadd.f32 %v1592_v18, %v572_v31  ;;  %v755_v46 = vmax.f32 %v1607_v49, %v1659_v32  ;;  %v811_v47 = vmax.f32 %v1610_v50, %v1662_v33 }
  0xf8   :  { %v428_v44 = vadd.f32 %v1167_v40, %v1592_v18  ;;  %v588_v45 = vadd.f32 %v1215_v41, %v1592_v18  ;;  %v748_v48 = vmax.f32 %v1615_v55, %v1665_v34  ;;  %v804_v51 = vmax.f32 %v1618_v56, %v1668_v35 }
  0xf9   :  { %v422_v52 = vpop.f32.mrf.mxu0  ;;  %v582_v53 = vpop.f32.mrf.mxu1  ;;  %v1689_v54 = vsel %vm745_vm2, %v692_v38, -inf  ;;  %v1692_v57 = vsel %vm745_vm2, %v724_v39, -inf  ;;  %v691_v58 = vmax.f32 %v413_v42, 0.0  ;;  %v723_v61 = vmax.f32 %v573_v43, 0.0 }
  0xfa   :  { %v694_v62 = vmax.f32 %v428_v44, 0.0  ;;  %v726_v63 = vmax.f32 %v588_v45, 0.0  ;;  %v423_v0 = vadd.f32 %v1592_v18, %v422_v52  ;;  %v583_v3 = vadd.f32 %v1592_v18, %v582_v53 }
  0xfb   :  { %v1170_v4 = vpop.f32.mrf.mxu0  ;;  %v1218_v5 = vpop.f32.mrf.mxu1  ;;  %v1697_v6 = vsel %vm745_vm2, %v691_v58, -inf  ;;  %v1700_v7 = vsel %vm745_vm2, %v723_v61, -inf  ;;  %v769_v10 = vmax.f32 %v1621_v59, %v1689_v54  ;;  %v825_v13 = vmax.f32 %v1624_v60, %v1692_v57 }
  0xfc   :  { %v438_v8 = vadd.f32 %v1170_v4, %v1592_v18  ;;  %v598_v9 = vadd.f32 %v1218_v5, %v1592_v18  ;;  %v762_v14 = vmax.f32 %v1629_v1, %v1697_v6  ;;  %v818_v15 = vmax.f32 %v1632_v2, %v1700_v7 }
  0xfd   :  { %v432_v16 = vpop.f32.mrf.mxu0  ;;  %v592_v17 = vpop.f32.mrf.mxu1  ;;  %v1713_v19 = vsel %vm745_vm2, %v694_v62, -inf  ;;  %v1716_v20 = vsel %vm745_vm2, %v726_v63, -inf  ;;  %v693_v21 = vmax.f32 %v423_v0, 0.0  ;;  %v725_v22 = vmax.f32 %v583_v3, 0.0 }
  0xfe   :  { %v696_v23 = vmax.f32 %v438_v8, 0.0  ;;  %v728_v24 = vmax.f32 %v598_v9, 0.0  ;;  %v433_v25 = vadd.f32 %v1592_v18, %v432_v16  ;;  %v593_v30 = vadd.f32 %v1592_v18, %v592_v17 }
  0xff   :  { %v1173_v31 = vpop.f32.mrf.mxu0  ;;  %v1221_v38 = vpop.f32.mrf.mxu1  ;;  %v1721_v39 = vsel %vm745_vm2, %v693_v21, -inf  ;;  %v1724_v40 = vsel %vm745_vm2, %v725_v22, -inf  ;;  %v783_v43 = vmax.f32 %v1637_v11, %v1713_v19  ;;  %v839_v44 = vmax.f32 %v1640_v12, %v1716_v20 }
 0x100   :  { %v448_v41 = vadd.f32 %v1173_v31, %v1592_v18  ;;  %v608_v42 = vadd.f32 %v1221_v38, %v1592_v18  ;;  %v1737_v61 = vsel %vm745_vm2, %v696_v23, -inf  ;;  %v1740_v62 = vsel %vm745_vm2, %v728_v24, -inf }
 0x101   :  { %v442_v53 = vpop.f32.mrf.mxu0  ;;  %v602_v58 = vpop.f32.mrf.mxu1  ;;  %v695_v63 = vmax.f32 %v433_v25, 0.0  ;;  %v727_v0 = vmax.f32 %v593_v30, 0.0  ;;  %v1983_v11 = vmax.f32 %v1650_v27, %v1724_v40  ;;  %v1985_v27 = vmax.f32 %v1656_v29, %v1740_v62 }
 0x102   :  { %v698_v3 = vmax.f32 %v448_v41, 0.0  ;;  %v730_v4 = vmax.f32 %v608_v42, 0.0  ;;  %v443_v5 = vadd.f32 %v1592_v18, %v442_v53  ;;  %v603_v8 = vadd.f32 %v1592_v18, %v602_v58 }
 0x103   :  { %v1176_v9 = vpop.f32.mrf.mxu0  ;;  %v1224_v16 = vpop.f32.mrf.mxu1  ;;  %v1745_v17 = vsel %vm745_vm2, %v695_v63, -inf  ;;  %v1748_v21 = vsel %vm745_vm2, %v727_v0, -inf }
 0x104   :  { %v458_v22 = vadd.f32 %v1176_v9, %v1592_v18  ;;  %v618_v23 = vadd.f32 %v1224_v16, %v1592_v18  ;;  %v756_v42 = vsel %vm745_vm2, %v698_v3, -inf  ;;  %v812_v53 = vsel %vm745_vm2, %v730_v4, -inf }
 0x105   :  { %v452_v38 = vpop.f32.mrf.mxu0  ;;  %v612_v41 = vpop.f32.mrf.mxu1  ;;  %v697_v58 = vmax.f32 %v443_v5, 0.0  ;;  %v729_v63 = vmax.f32 %v603_v8, 0.0  ;;  %v1771_v4 = vmax.f32 %v755_v46, %v756_v42  ;;  %v1776_v5 = vmax.f32 %v811_v47, %v812_v53 }
 0x106   :  { %v700_v0 = vmax.f32 %v458_v22, 0.0  ;;  %v732_v9 = vmax.f32 %v618_v23, 0.0  ;;  %v453_v16 = vadd.f32 %v1592_v18, %v452_v38  ;;  %v613_v25 = vadd.f32 %v1592_v18, %v612_v41 }
 0x107   :  { %v1179_v24 = vpop.f32.mrf.mxu0  ;;  %v1227_v52 = vpop.f32.mrf.mxu1  ;;  %v749_v30 = vsel %vm745_vm2, %v697_v58, -inf  ;;  %v805_v31 = vsel %vm745_vm2, %v729_v63, -inf }
 0x108   :  { %v468_v45 = vadd.f32 %v1179_v24, %v1592_v18  ;;  %v628_v3 = vadd.f32 %v1227_v52, %v1592_v18  ;;  %v1781_v8 = vmax.f32 %v748_v48, %v749_v30  ;;  %v1786_v22 = vmax.f32 %v804_v51, %v805_v31 }
 0x109   :  { %v462_v52 = vpop.f32.mrf.mxu0  ;;  %v622_v23 = vpop.f32.mrf.mxu1  ;;  %v770_v49 = vsel %vm745_vm2, %v700_v0, -inf  ;;  %v826_v32 = vsel %vm745_vm2, %v732_v9, -inf  ;;  %v699_v46 = vmax.f32 %v453_v16, 0.0  ;;  %v731_v50 = vmax.f32 %v613_v25, 0.0 }
 0x10a   :  { %v702_v33 = vmax.f32 %v468_v45, 0.0  ;;  %v734_v47 = vmax.f32 %v628_v3, 0.0  ;;  %v463_v24 = vadd.f32 %v1592_v18, %v462_v52  ;;  %v623_v55 = vadd.f32 %v1592_v18, %v622_v23 }
 0x10b   :  { %v1182_v34 = vpop.f32.mrf.mxu0  ;;  %v1230_v48 = vpop.f32.mrf.mxu1  ;;  %v763_v56 = vsel %vm745_vm2, %v699_v46, -inf  ;;  %v819_v35 = vsel %vm745_vm2, %v731_v50, -inf  ;;  %v1799_v25 = vmax.f32 %v769_v10, %v770_v49  ;;  %v1804_v45 = vmax.f32 %v825_v13, %v826_v32 }
 0x10c   :  { %v478_v51 = vadd.f32 %v1182_v34, %v1592_v18  ;;  %v638_v30 = vadd.f32 %v1230_v48, %v1592_v18  ;;  %v1809_v31 = vmax.f32 %v762_v14, %v763_v56  ;;  %v1814_v38 = vmax.f32 %v818_v15, %v819_v35 }
 0x10d   :  { %v472_v41 = vpop.f32.mrf.mxu0  ;;  %v632_v42 = vpop.f32.mrf.mxu1  ;;  %v784_v59 = vsel %vm745_vm2, %v702_v33, -inf  ;;  %v840_v54 = vsel %vm745_vm2, %v734_v47, -inf  ;;  %v701_v10 = vmax.f32 %v463_v24, 0.0  ;;  %v733_v60 = vmax.f32 %v623_v55, 0.0 }
 0x10e   :  { %v704_v57 = vmax.f32 %v478_v51, 0.0  ;;  %v736_v13 = vmax.f32 %v638_v30, 0.0  ;;  %v473_v53 = vadd.f32 %v1592_v18, %v472_v41  ;;  %v633_v1 = vadd.f32 %v1592_v18, %v632_v42 }
 0x10f   :  { %v1185_v6 = vpop.f32.mrf.mxu0  ;;  %v1233_v14 = vpop.f32.mrf.mxu1  ;;  %v777_v2 = vsel %vm745_vm2, %v701_v10, -inf  ;;  %v833_v7 = vsel %vm745_vm2, %v733_v60, -inf  ;;  %v1827_v63 = vmax.f32 %v783_v43, %v784_v59  ;;  %v1832_v0 = vmax.f32 %v839_v44, %v840_v54 }
 0x110   :  { %v488_v15 = vadd.f32 %v1185_v6, %v1592_v18  ;;  %v648_v58 = vadd.f32 %v1233_v14, %v1592_v18  ;;  %v798_v9 = vsel %vm745_vm2, %v704_v57, -inf  ;;  %v854_v16 = vsel %vm745_vm2, %v736_v13, -inf }
 0x111   :  { %v482_v3 = vpop.f32.mrf.mxu0  ;;  %v642_v52 = vpop.f32.mrf.mxu1  ;;  %v1982_v23 = vmax.f32 %v1647_v26, %v1721_v39  ;;  %v1844_v19 = vmax.f32 %v1983_v11, %v833_v7  ;;  %v703_v43 = vmax.f32 %v473_v53, 0.0  ;;  %v735_v12 = vmax.f32 %v633_v1, 0.0 }
 0x112   :  { %v706_v20 = vmax.f32 %v488_v15, 0.0  ;;  %v738_v44 = vmax.f32 %v648_v58, 0.0  ;;  %v483_v32 = vadd.f32 %v1592_v18, %v482_v3  ;;  %v643_v46 = vadd.f32 %v1592_v18, %v642_v52 }
 0x113   :  { %v1839_v49 = vmax.f32 %v1982_v23, %v777_v2  ;;  %v1188_v50 = vpop.f32.mrf.mxu0  ;;  %v1236_v33 = vpop.f32.mrf.mxu1  ;;  %v1984_v26 = vmax.f32 %v1653_v28, %v1737_v61  ;;  %v1856_v40 = vmax.f32 %v1985_v27, %v854_v16  ;;  %v1861_v55 = vsel %vm745_vm2, %v703_v43, -inf }
 0x114   :  { %v498_v47 = vadd.f32 %v1188_v50, %v1592_v18  ;;  %v658_v24 = vadd.f32 %v1236_v33, %v1592_v18  ;;  %v1864_v34 = vsel %vm745_vm2, %v735_v12, -inf  ;;  %v758_v48 = vsel %vm745_vm2, %v706_v20, -inf }
 0x115   :  { %v1851_v39 = vmax.f32 %v1984_v26, %v798_v9  ;;  %v814_v28 = vsel %vm745_vm2, %v738_v44, -inf  ;;  %v492_v61 = vpop.f32.mrf.mxu0  ;;  %v652_v56 = vpop.f32.mrf.mxu1  ;;  %v759_v29 = vmax.f32 %v1771_v4, %v758_v48  ;;  %v705_v35 = vmax.f32 %v483_v32, 0.0 }
 0x116   :  { %v815_v62 = vmax.f32 %v1776_v5, %v814_v28  ;;  %v737_v51 = vmax.f32 %v643_v46, 0.0  ;;  %v708_v30 = vmax.f32 %v498_v47, 0.0  ;;  %v740_v41 = vmax.f32 %v658_v24, 0.0 }
 0x117   :  { %v493_v42 = vadd.f32 %v1592_v18, %v492_v61  ;;  %v653_v59 = vadd.f32 %v1592_v18, %v652_v56  ;;  %v1191_v54 = vpop.f32.mrf.mxu0  ;;  %v1239_v10 = vpop.f32.mrf.mxu1  ;;  %v1026_v60 = vpack.c.bf16 %v759_v29, %v759_v29  ;;  %v751_v13 = vsel %vm745_vm2, %v705_v35, -inf }
 0x118   :  { %v1034_v57 = vpack.c.bf16 %v815_v62, %v815_v62  ;;  %v807_v53 = vsel %vm745_vm2, %v737_v51, -inf  ;;  %v752_v4 = vmax.f32 %v1781_v8, %v751_v13  ;;  %v772_v1 = vsel %vm745_vm2, %v708_v30, -inf }
 0x119   :  { %v808_v5 = vmax.f32 %v1786_v22, %v807_v53  ;;  %v828_v6 = vsel %vm745_vm2, %v740_v41, -inf  ;;  %v502_v14 = vpop.f32.mrf.mxu0  ;;  %v662_v2 = vpop.f32.mrf.mxu1  ;;  %924 = vst.msk [vmem:[%s1981_s3 + $0x4] sm:$0xf] %vm922_vm3, %v1026_v60  ;;  %v773_v8 = vmax.f32 %v1799_v25, %v772_v1  ;;  %v707_v7 = vmax.f32 %v493_v42, 0.0 }
 0x11a   :  { %932 = vst.msk [vmem:[%s1981_s3 + $0x24] sm:$0xf] %vm922_vm3, %v1034_v57  ;;  %v829_v22 = vmax.f32 %v1804_v45, %v828_v6  ;;  %v739_v15 = vmax.f32 %v653_v59, 0.0  ;;  %v1025_v58 = vpack.c.bf16 %v752_v4, %v752_v4  ;;  %v508_v16 = vadd.f32 %v1191_v54, %v1592_v18 }
 0x11b   :  { %v1033_v9 = vpack.c.bf16 %v808_v5, %v808_v5  ;;  %v668_v3 = vadd.f32 %v1239_v10, %v1592_v18  ;;  %v1194_v52 = vpop.f32.mrf.mxu0  ;;  %v1242_v23 = vpop.f32.mrf.mxu1  ;;  %v1028_v11 = vpack.c.bf16 %v773_v8, %v773_v8  ;;  %v765_v12 = vsel %vm745_vm2, %v707_v7, -inf }
 0x11c   :  { %v1036_v43 = vpack.c.bf16 %v829_v22, %v829_v22  ;;  %v821_v20 = vsel %vm745_vm2, %v739_v15, -inf  ;;  %923 = vst.msk [vmem:[%s1981_s3] sm:$0xf] %vm922_vm3, %v1025_v58  ;;  %v766_v25 = vmax.f32 %v1809_v31, %v765_v12  ;;  %v710_v44 = vmax.f32 %v508_v16, 0.0 }
 0x11d   :  { %931 = vst.msk [vmem:[%s1981_s3 + $0x20] sm:$0xf] %vm922_vm3, %v1033_v9  ;;  %v822_v45 = vmax.f32 %v1814_v38, %v821_v20  ;;  %v742_v32 = vmax.f32 %v668_v3, 0.0  ;;  %926 = vst.msk [vmem:[%s1981_s3 + $0xc] sm:$0xf] %vm922_vm3, %v1028_v11  ;;  %v503_v46 = vadd.f32 %v1592_v18, %v502_v14  ;;  %v663_v50 = vadd.f32 %v1592_v18, %v662_v2  ;;  %v512_v33 = vpop.f32.mrf.mxu0  ;;  %v672_v26 = vpop.f32.mrf.mxu1 }
 0x11e   :  { %934 = vst.msk [vmem:[%s1981_s3 + $0x2c] sm:$0xf] %vm922_vm3, %v1036_v43  ;;  %v518_v31 = vadd.f32 %v1194_v52, %v1592_v18  ;;  %v678_v38 = vadd.f32 %v1242_v23, %v1592_v18  ;;  %v1027_v27 = vpack.c.bf16 %v766_v25, %v766_v25  ;;  %v786_v24 = vsel %vm745_vm2, %v710_v44, -inf }
 0x11f   :  { %v1035_v47 = vpack.c.bf16 %v822_v45, %v822_v45  ;;  %v842_v48 = vsel %vm745_vm2, %v742_v32, -inf  ;;  %v787_v28 = vmax.f32 %v1827_v63, %v786_v24  ;;  %v709_v56 = vmax.f32 %v503_v46, 0.0 }
 0x120   :  { %v843_v61 = vmax.f32 %v1832_v0, %v842_v48  ;;  %v741_v29 = vmax.f32 %v663_v50, 0.0  ;;  %925 = vst.msk [vmem:[%s1981_s3 + $0x8] sm:$0xf] %vm922_vm3, %v1027_v27  ;;  %v712_v62 = vmax.f32 %v518_v31, 0.0  ;;  %v744_v35 = vmax.f32 %v678_v38, 0.0 }
 0x121   :  { %933 = vst.msk [vmem:[%s1981_s3 + $0x28] sm:$0xf] %vm922_vm3, %v1035_v47  ;;  %v513_v51 = vadd.f32 %v1592_v18, %v512_v33  ;;  %v673_v63 = vadd.f32 %v1592_v18, %v672_v26  ;;  %v1030_v30 = vpack.c.bf16 %v787_v28, %v787_v28  ;;  %v779_v41 = vsel %vm745_vm2, %v709_v56, -inf }
 0x122   :  { %v1038_v0 = vpack.c.bf16 %v843_v61, %v843_v61  ;;  %v835_v42 = vsel %vm745_vm2, %v741_v29, -inf  ;;  %v780_v59 = vmax.f32 %v1839_v49, %v779_v41  ;;  %v800_v10 = vsel %vm745_vm2, %v712_v62, -inf }
 0x123   :  { %v836_v54 = vmax.f32 %v1844_v19, %v835_v42  ;;  %v856_v60 = vsel %vm745_vm2, %v744_v35, -inf  ;;  %928 = vst.msk [vmem:[%s1981_s3 + $0x14] sm:$0xf] %vm922_vm3, %v1030_v30  ;;  %v801_v18 = vmax.f32 %v1851_v39, %v800_v10  ;;  %v711_v57 = vmax.f32 %v513_v51, 0.0 }
 0x124   :  { %936 = vst.msk [vmem:[%s1981_s3 + $0x34] sm:$0xf] %vm922_vm3, %v1038_v0  ;;  %v857_v49 = vmax.f32 %v1856_v40, %v856_v60  ;;  %v743_v19 = vmax.f32 %v673_v63, 0.0  ;;  %v1986_v13 = vmax.f32 %v1671_v36, %v1745_v17  ;;  %v1987_v4 = vmax.f32 %v1674_v37, %v1748_v21 }
 0x125   :  { %v1029_v1 = vpack.c.bf16 %v780_v59, %v780_v59  ;;  %v1037_v6 = vpack.c.bf16 %v836_v54, %v836_v54  ;;  %v1032_v14 = vpack.c.bf16 %v801_v18, %v801_v18  ;;  %v793_v39 = vsel %vm745_vm2, %v711_v57, -inf }
 0x126   :  { %v792_v53 = vmax.f32 %v1986_v13, %v1861_v55  ;;  %v848_v5 = vmax.f32 %v1987_v4, %v1864_v34  ;;  %v1040_v2 = vpack.c.bf16 %v857_v49, %v857_v49  ;;  %v849_v40 = vsel %vm745_vm2, %v743_v19, -inf }
 0x127   :  { %927 = vst.msk [vmem:[%s1981_s3 + $0x10] sm:$0xf] %vm922_vm3, %v1029_v1  ;;  %935 = vst.msk [vmem:[%s1981_s3 + $0x30] sm:$0xf] %vm922_vm3, %v1037_v6 }
 0x128   :  { %v794_v36 = vmax.f32 %v792_v53, %v793_v39  ;;  %v850_v37 = vmax.f32 %v848_v5, %v849_v40  ;;  %930 = vst.msk [vmem:[%s1981_s3 + $0x1c] sm:$0xf] %vm922_vm3, %v1032_v14  ;;  %938 = vst.msk [vmem:[%s1981_s3 + $0x3c] sm:$0xf] %vm922_vm3, %v1040_v2 }
 0x12a   :  { %v1031_v17 = vpack.c.bf16 %v794_v36, %v794_v36  ;;  %v1039_v21 = vpack.c.bf16 %v850_v37, %v850_v37 }
 0x12c   :  { %929 = vst.msk [vmem:[%s1981_s3 + $0x18] sm:$0xf] %vm922_vm3, %v1031_v17  ;;  %937 = vst.msk [vmem:[%s1981_s3 + $0x38] sm:$0xf] %vm922_vm3, %v1039_v21 }

// kernel: pallas_forward.3
= control target key start
LH: loop header
LB: loop body
LE: loop exit
PB: predicated region body
PF: predicated region fallthrough
CT: control target
= control target key end

     0   :  { %8 = vsyncpa [#allocation3], 0  ;;  %s1677_s12 = smov 0   ;;  %s1861_s0 = inlined_call_operand.vmem [shape: bf16[2,4096], index: 0, kind: input, shape index: {}]   ;;  %s1862_s1 = inlined_call_operand.vmem [shape: bf16[4096,256], index: 1, kind: input, shape index: {}]   ;;  %s1863_s2 = inlined_call_operand.vmem [shape: f32[1,256], index: 2, kind: input, shape index: {}]   ;;  %s1864_s3 = inlined_call_operand.hbm [shape: f32[2,256], index: 3, kind: output, shape index: {}]  }
   0x1 LB: > { %s1683_s13 = sadd.s32 4294967295, %s1652_s12   ;;  %p1268_p0 = scmp.ge.s32.totalorder %s1652_s12, 1  ;;  %s1652_s12 = sphi %s1677_s12, %s14_s12  }
   0x2   : > { %p145_p1 = scmp.lt.s32.totalorder %s1652_s12, 5 }
   0x4   : > { %p146_p2 = pnand %p1268_p0, %p145_p1 }
   0x5   : > { %s1269_s14 = sshll.u32 (!%p146_p2), %s1683_s13, 3  ;;  %s1270_s15 = sshll.u32 (!%p146_p2), %s1683_s13, 7 }
   0x6   : > { %149 = sbr.rel (%p146_p2) target bundleno = 368 (0x170), region = 32  ;;  %p170_p3 = scmp.lt.s32.totalorder (!%p146_p2), %s1269_s14, 31 }
   0x7   : > { %p175_p4 = scmp.lt.s32.totalorder (!%p146_p2), %s1270_s15, 511  ;;  %p1273_p5 = scmp.ne.s32.totalorder (!%p146_p2), %s1683_s13, 0 }
   0xb   : > { %s1866_s14 = smov (!%p170_p3, %s1269_s14), 31  ;;  %s1868_s15 = smov (!%p175_p4, %s1270_s15), 511 }
   0xc   : > { %s172_s18 = scalar_lea.vmem %s1861_s0, %s1866_s14  ;;  %s1407_s19 = sshll.u32 %s1868_s15, 3 }
   0xd   : > { %s1698_s22 = scalar_lea.vmem %s1862_s1, %s1407_s19  ;;  %184 = sbr.rel (%p1273_p5) target bundleno = 29 (0x1d), region = 36 }
  0x12   : > { %v187_v0 = vlaneseq  ;;  %v185_v2 = vld [vmem:[%s1863_s2] sm:$0x3] }
  0x14   : > { %v188_v1 = vshrl.u32 %v187_v0, 7 }
  0x16   : > { %v189_v3 = vsub.s32 0, %v188_v1  ;;  %v193_v4 = vsub.s32 1, %v188_v1 }
  0x18   : > { %v190_v5 = vrot.slane %v185_v2, %v189_v3  ;;  %v194_v6 = vrot.slane %v185_v2, %v193_v4 }
  0x1a   : > { %v195_v7 = vcombine.low %v190_v5, %v194_v6 }
  0x1c   : > { %1274 = vst.sshfl [vmem:[#allocation2] sm:$0x33 pattern:$0x76325410] %v195_v7 }
  0x1d PF: > { %v1425_v8 = vld [vmem:[%s1698_s22 + $0x74] ss:$8 sps:$4 sm:$0xff]   ;;  %v1429_v10 = vld [vmem:[%s1698_s22 + $0x70] ss:$8 sps:$4 sm:$0xff]   ;;  %v1431_v12 = vld [vmem:[%s1698_s22 + $0x64] ss:$8 sps:$4 sm:$0xff]   ;;  %v340_v46 = vlaneseq }
  0x1e   : > { %v1427_v9 = vld [vmem:[%s1698_s22 + $0x174] ss:$8 sps:$4 sm:$0xff]   ;;  %1033 = vmatprep.subr.bf16.mxu0 %v1425_v8  ;;  %v1430_v11 = vld [vmem:[%s1698_s22 + $0x170] ss:$8 sps:$4 sm:$0xff]   ;;  %v1433_v13 = vld [vmem:[%s1698_s22 + $0x164] ss:$8 sps:$4 sm:$0xff]  }
  0x1f   : > { %1074 = vmatprep.subr.bf16.mxu1 %v1427_v9  ;;  %1034 = vmatpush1.bf16.msra.mxu0 %v1429_v10  ;;  %v1435_v14 = vld [vmem:[%s1698_s22 + $0x60] ss:$8 sps:$4 sm:$0xff]   ;;  %v1437_v16 = vld [vmem:[%s1698_s22 + $0x54] ss:$8 sps:$4 sm:$0xff]   ;;  %v1441_v18 = vld [vmem:[%s1698_s22 + $0x50] ss:$8 sps:$4 sm:$0xff]  }
  0x20   : > { %1075 = vmatpush1.bf16.msra.mxu1 %v1430_v11  ;;  %1035 = vmatprep.subr.bf16.mxu0 %v1431_v12  ;;  %v1436_v15 = vld [vmem:[%s1698_s22 + $0x160] ss:$8 sps:$4 sm:$0xff]   ;;  %v1439_v17 = vld [vmem:[%s1698_s22 + $0x154] ss:$8 sps:$4 sm:$0xff]   ;;  %v1442_v19 = vld [vmem:[%s1698_s22 + $0x150] ss:$8 sps:$4 sm:$0xff]  }
  0x21   : > { %1076 = vmatprep.subr.bf16.mxu1 %v1433_v13  ;;  %v1443_v20 = vld [vmem:[%s1698_s22 + $0x44] ss:$8 sps:$4 sm:$0xff]   ;;  %v1447_v22 = vld [vmem:[%s1698_s22 + $0x40] ss:$8 sps:$4 sm:$0xff]   ;;  %v1449_v24 = vld [vmem:[%s1698_s22 + $0x34] ss:$8 sps:$4 sm:$0xff]  }
  0x22   : > { %v1445_v21 = vld [vmem:[%s1698_s22 + $0x144] ss:$8 sps:$4 sm:$0xff]   ;;  %v1448_v23 = vld [vmem:[%s1698_s22 + $0x140] ss:$8 sps:$4 sm:$0xff]   ;;  %v1451_v25 = vld [vmem:[%s1698_s22 + $0x134] ss:$8 sps:$4 sm:$0xff]  }
  0x23   : > { %1036 = vmatpush1.bf16.msra.mxu0 %v1435_v14  ;;  %v1453_v26 = vld [vmem:[%s1698_s22 + $0x30] ss:$8 sps:$4 sm:$0xff]   ;;  %v1455_v28 = vld [vmem:[%s1698_s22 + $0x24] ss:$8 sps:$4 sm:$0xff]   ;;  %v1459_v30 = vld [vmem:[%s1698_s22 + $0x20] ss:$8 sps:$4 sm:$0xff]  }
  0x24   : > { %1077 = vmatpush1.bf16.msra.mxu1 %v1436_v15  ;;  %1037 = vmatprep.subr.bf16.mxu0 %v1437_v16  ;;  %v1454_v27 = vld [vmem:[%s1698_s22 + $0x130] ss:$8 sps:$4 sm:$0xff]   ;;  %v1457_v29 = vld [vmem:[%s1698_s22 + $0x124] ss:$8 sps:$4 sm:$0xff]   ;;  %v1460_v31 = vld [vmem:[%s1698_s22 + $0x120] ss:$8 sps:$4 sm:$0xff]  }
  0x25   : > { %1078 = vmatprep.subr.bf16.mxu1 %v1439_v17  ;;  %v1461_v32 = vld [vmem:[%s1698_s22 + $0x14] ss:$8 sps:$4 sm:$0xff]   ;;  %v1465_v34 = vld [vmem:[%s1698_s22 + $0x10] ss:$8 sps:$4 sm:$0xff]   ;;  %v1467_v36 = vld [vmem:[%s1698_s22 + $0x4] ss:$8 sps:$4 sm:$0xff]  }
  0x26   : > { %v1463_v33 = vld [vmem:[%s1698_s22 + $0x114] ss:$8 sps:$4 sm:$0xff]   ;;  %v1466_v35 = vld [vmem:[%s1698_s22 + $0x110] ss:$8 sps:$4 sm:$0xff]   ;;  %v1469_v37 = vld [vmem:[%s1698_s22 + $0x104] ss:$8 sps:$4 sm:$0xff]  }
  0x27   : > { %1038 = vmatpush1.bf16.msra.mxu0 %v1441_v18  ;;  %v1471_v38 = vld [vmem:[%s1698_s22] ss:$8 sps:$4 sm:$0xff]   ;;  %v1473_v40 = vld [vmem:[%s1698_s22 + $0xf4] ss:$8 sps:$4 sm:$0xff]   ;;  %v1477_v42 = vld [vmem:[%s1698_s22 + $0xf0] ss:$8 sps:$4 sm:$0xff]  }
  0x28   : > { %1079 = vmatpush1.bf16.msra.mxu1 %v1442_v19  ;;  %1039 = vmatprep.subr.bf16.mxu0 %v1443_v20  ;;  %v1472_v39 = vld [vmem:[%s1698_s22 + $0x100] ss:$8 sps:$4 sm:$0xff]   ;;  %v1475_v41 = vld [vmem:[%s1698_s22 + $0x1f4] ss:$8 sps:$4 sm:$0xff]   ;;  %v1478_v43 = vld [vmem:[%s1698_s22 + $0x1f0] ss:$8 sps:$4 sm:$0xff]  }
  0x29   : > { %1080 = vmatprep.subr.bf16.mxu1 %v1445_v21  ;;  %v1654_v44 = vmov 1966171168   ;;  %v1479_v47 = vld [vmem:[%s1698_s22 + $0xe4] ss:$8 sps:$4 sm:$0xff]   ;;  %v1483_v49 = vld [vmem:[%s1698_s22 + $0xe0] ss:$8 sps:$4 sm:$0xff]  }
  0x2a   : > { %v338_v45 = vunpack.c.l.s4 %v1654_v44  ;;  %v1481_v48 = vld [vmem:[%s1698_s22 + $0x1e4] ss:$8 sps:$4 sm:$0xff]   ;;  %v1743_v51 = vshrl.u32 %v340_v46, 7  ;;  %v1484_v52 = vld [vmem:[%s1698_s22 + $0x1e0] ss:$8 sps:$4 sm:$0xff]   ;;  %s1656_s27 = smov [#allocation2]  }
  0x2b   : > { %1040 = vmatpush1.bf16.msra.mxu0 %v1447_v22  ;;  %v1485_v53 = vld [vmem:[%s1698_s22 + $0xd4] ss:$8 sps:$4 sm:$0xff]   ;;  %v1489_v55 = vld [vmem:[%s1698_s22 + $0xd0] ss:$8 sps:$4 sm:$0xff]   ;;  %v1491_v58 = vld [vmem:[%s1698_s22 + $0xc4] ss:$8 sps:$4 sm:$0xff]  }
  0x2c   : > { %1081 = vmatpush1.bf16.msra.mxu1 %v1448_v23  ;;  %1041 = vmatprep.subr.bf16.mxu0 %v1449_v24  ;;  %v339_v50 = vunpack.c.0.s8 %v338_v45  ;;  %v1487_v54 = vld [vmem:[%s1698_s22 + $0x1d4] ss:$8 sps:$4 sm:$0xff]   ;;  %v1490_v56 = vld [vmem:[%s1698_s22 + $0x1d0] ss:$8 sps:$4 sm:$0xff]   ;;  %v1493_v59 = vld [vmem:[%s1698_s22 + $0x1c4] ss:$8 sps:$4 sm:$0xff]  }
  0x2d   : > { %1082 = vmatprep.subr.bf16.mxu1 %v1451_v25  ;;  %v206_v60 = vld [vmem:[%s172_s18] sm:$0xff]  ;;  %v1497_v1 = vld [vmem:[%s1698_s22 + $0xb4] ss:$8 sps:$4 sm:$0xff]   ;;  %v1501_v5 = vld [vmem:[%s1698_s22 + $0xb0] ss:$8 sps:$4 sm:$0xff]   ;;  %s1217_s28 = sshll.u32 %s1656_s27, 4  ;;  %s1218_s28 = int_to_ptr.vmem [resolvable:$true] %s1217_s28 }
  0x2e   : > { %v342_v57 = vsub.s32 %v339_v50, %v1743_v51  ;;  %v1495_v61 = vld [vmem:[%s1698_s22 + $0xc0] ss:$8 sps:$4 sm:$0xff]   ;;  %v336_v62 = vcombine.high %v206_v60, %v206_v60  ;;  %v1499_v2 = vld [vmem:[%s1698_s22 + $0x1b4] ss:$8 sps:$4 sm:$0xff]   ;;  %v1502_v8 = vld [vmem:[%s1698_s22 + $0x1b0] ss:$8 sps:$4 sm:$0xff]   ;;  %p1625_p10 = scmp.lt.s32.totalorder %s1218_s28, %s1218_s28 }
  0x2f   : > { %1042 = vmatpush1.bf16.msra.mxu0 %v1453_v26  ;;  %v1496_v0 = vld [vmem:[%s1698_s22 + $0x1c0] ss:$8 sps:$4 sm:$0xff]   ;;  %v1503_v9 = vld [vmem:[%s1698_s22 + $0xa4] ss:$8 sps:$4 sm:$0xff]   ;;  %v1509_v14 = vld [vmem:[%s1698_s22 + $0x94] ss:$8 sps:$4 sm:$0xff]  }
  0x30   : > { %1083 = vmatpush1.bf16.msra.mxu1 %v1454_v27  ;;  %1043 = vmatprep.subr.bf16.mxu0 %v1455_v28  ;;  %v343_v63 = vrot.slane %v206_v60, %v342_v57  ;;  %v350_v4 = vrot.slane %v336_v62, %v342_v57  ;;  %v1505_v10 = vld [vmem:[%s1698_s22 + $0x1a4] ss:$8 sps:$4 sm:$0xff]   ;;  %v1507_v12 = vld [vmem:[%s1698_s22 + $0xa0] ss:$8 sps:$4 sm:$0xff]   ;;  %v1511_v15 = vld [vmem:[%s1698_s22 + $0x194] ss:$8 sps:$4 sm:$0xff]  }
  0x31   : > { %1084 = vmatprep.subr.bf16.mxu1 %v1457_v29  ;;  %v1508_v13 = vld [vmem:[%s1698_s22 + $0x1a0] ss:$8 sps:$4 sm:$0xff]   ;;  %v1513_v16 = vld [vmem:[%s1698_s22 + $0x90] ss:$8 sps:$4 sm:$0xff]   ;;  %v1515_v18 = vld [vmem:[%s1698_s22 + $0x84] ss:$8 sps:$4 sm:$0xff]  }
  0x32   : > { %v351_v3 = vcombine.high %v343_v63, %v343_v63  ;;  %v1763_v7 = vrot.slane %v350_v4, %v342_v57  ;;  %v1514_v17 = vld [vmem:[%s1698_s22 + $0x190] ss:$8 sps:$4 sm:$0xff]   ;;  %v1517_v19 = vld [vmem:[%s1698_s22 + $0x184] ss:$8 sps:$4 sm:$0xff]   ;;  %v352_v20 = vcombine.high %v350_v4, %v350_v4  ;;  %v1519_v21 = vld [vmem:[%s1698_s22 + $0x80] ss:$8 sps:$4 sm:$0xff]   ;;  %v359_v22 = vrot.slane %v343_v63, %v342_v57 }
  0x33   : > { %1044 = vmatpush1.bf16.msra.mxu0 %v1459_v30  ;;  %v1520_v23 = vld [vmem:[%s1698_s22 + $0x180] ss:$8 sps:$4 sm:$0xff]   ;;  %v1524_v24 = vld [vmem:[%s1698_s22 + $0x274] ss:$8 sps:$4 sm:$0xff]   ;;  %v1522_v28 = vld [vmem:[%s1698_s22 + $0x270] ss:$8 sps:$4 sm:$0xff]  }
  0x34   : > { %1085 = vmatpush1.bf16.msra.mxu1 %v1460_v31  ;;  %1045 = vmatprep.subr.bf16.mxu0 %v1461_v32  ;;  %v373_v6 = vrot.slane %v351_v3, %v342_v57  ;;  %v1527_v25 = vld [vmem:[%s1698_s22 + $0x374] ss:$8 sps:$4 sm:$0xff]   ;;  %v380_v26 = vrot.slane %v352_v20, %v342_v57  ;;  %v381_v27 = vcombine.high %v359_v22, %v359_v22  ;;  %v1525_v29 = vld [vmem:[%s1698_s22 + $0x370] ss:$8 sps:$4 sm:$0xff]   ;;  %v1530_v30 = vld [vmem:[%s1698_s22 + $0x264] ss:$8 sps:$4 sm:$0xff]  }
  0x35   : > { %1086 = vmatprep.subr.bf16.mxu1 %v1463_v33  ;;  %v1533_v31 = vld [vmem:[%s1698_s22 + $0x364] ss:$8 sps:$4 sm:$0xff]   ;;  %v1528_v33 = vld [vmem:[%s1698_s22 + $0x260] ss:$8 sps:$4 sm:$0xff]   ;;  %v1551_v44 = vld [vmem:[%s1698_s22 + $0x334] ss:$8 sps:$4 sm:$0xff]  }
  0x36   : > { %v383_v11 = vcombine.high %v373_v6, %v373_v6  ;;  %1065 = vmatprep.mubr.bf16.mxu0 %v373_v6  ;;  %v384_v32 = vcombine.high %v380_v26, %v380_v26  ;;  %v1546_v45 = vld [vmem:[%s1698_s22 + $0x230] ss:$8 sps:$4 sm:$0xff]   ;;  %v1555_v50 = vld [vmem:[%s1698_s22 + $0x320] ss:$8 sps:$4 sm:$0xff]   ;;  %v1569_v57 = vld [vmem:[%s1698_s22 + $0x304] ss:$8 sps:$4 sm:$0xff]  }
  0x37   : > { %1046 = vmatpush1.bf16.msra.mxu0 %v1465_v34  ;;  %v1531_v34 = vld [vmem:[%s1698_s22 + $0x360] ss:$8 sps:$4 sm:$0xff]   ;;  %v1549_v46 = vld [vmem:[%s1698_s22 + $0x330] ss:$8 sps:$4 sm:$0xff]   ;;  %v1572_v60 = vld [vmem:[%s1698_s22 + $0x2f4] ss:$8 sps:$4 sm:$0xff]  }
  0x38   : > { %1087 = vmatpush1.bf16.msra.mxu1 %v1466_v35  ;;  %1047 = vmatprep.subr.bf16.mxu0 %v1467_v36  ;;  %v1536_v35 = vld [vmem:[%s1698_s22 + $0x254] ss:$8 sps:$4 sm:$0xff]   ;;  %v1570_v62 = vld [vmem:[%s1698_s22 + $0x2f0] ss:$8 sps:$4 sm:$0xff]   ;;  %v1579_v3 = vld [vmem:[%s1698_s22 + $0x3e0] ss:$8 sps:$4 sm:$0xff]  }
  0x39   : > { %1088 = vmatprep.subr.bf16.mxu1 %v1469_v37  ;;  %1106 = vmatprep.mubr.bf16.mxu1 %v383_v11  ;;  %v1539_v36 = vld [vmem:[%s1698_s22 + $0x354] ss:$8 sps:$4 sm:$0xff]   ;;  %v1534_v37 = vld [vmem:[%s1698_s22 + $0x250] ss:$8 sps:$4 sm:$0xff]   ;;  %v1588_v11 = vld [vmem:[%s1698_s22 + $0x2c0] ss:$8 sps:$4 sm:$0xff]  }
  0x3a   : > { %v1573_v63 = vld [vmem:[%s1698_s22 + $0x3f0] ss:$8 sps:$4 sm:$0xff]   ;;  %v1584_v4 = vld [vmem:[%s1698_s22 + $0x2d4] ss:$8 sps:$4 sm:$0xff]   ;;  %v1603_v20 = vld [vmem:[%s1698_s22 + $0x3a0] ss:$8 sps:$4 sm:$0xff]  }
  0x3b   : > { %1048 = vmatpush1.bf16.msra.mxu0 %v1471_v38  ;;  %v1537_v38 = vld [vmem:[%s1698_s22 + $0x350] ss:$8 sps:$4 sm:$0xff]   ;;  %p1412_p6 = scmp.eq.s32.totalorder %s1683_s13, 3  ;;  %s1618_s29 = scalar_lea.vmem %s1218_s28, 64 }
  0x3c   : > { %1089 = vmatpush1.bf16.msra.mxu1 %v1472_v39  ;;  %1049 = vmatprep.subr.bf16.mxu0 %v1473_v40  ;;  %v1542_v39 = vld [vmem:[%s1698_s22 + $0x244] ss:$8 sps:$4 sm:$0xff]   ;;  %v1582_v6 = vld [vmem:[%s1698_s22 + $0x2d0] ss:$8 sps:$4 sm:$0xff]   ;;  %p1619_p7 = scmp.ne.s32.totalorder %s1218_s28, %s1618_s29  ;;  %p1626_p11 = scmp.lt.s32.totalorder %s1618_s29, %s1618_s29 }
  0x3d   : > { %1090 = vmatprep.subr.bf16.mxu1 %v1475_v41  ;;  %v1545_v40 = vld [vmem:[%s1698_s22 + $0x344] ss:$8 sps:$4 sm:$0xff]   ;;  %v1540_v41 = vld [vmem:[%s1698_s22 + $0x240] ss:$8 sps:$4 sm:$0xff]  }
  0x3e   : > { %p1620_p8 = pnand %p1619_p7, %p1412_p6  ;;  %p1627_p12 = por %p1626_p11, %p1625_p10 }
  0x3f   : > { %1050 = vmatpush2.bf16.msra.mxu0 %v1477_v42  ;;  %v1543_v42 = vld [vmem:[%s1698_s22 + $0x340] ss:$8 sps:$4 sm:$0xff]  }
  0x40   : > { %1091 = vmatpush2.bf16.msra.mxu1 %v1478_v43  ;;  %1051 = vmatprep.subr.bf16.mxu0 %v1479_v47  ;;  %v1548_v43 = vld [vmem:[%s1698_s22 + $0x234] ss:$8 sps:$4 sm:$0xff]   ;;  %v1554_v47 = vld [vmem:[%s1698_s22 + $0x224] ss:$8 sps:$4 sm:$0xff]   ;;  %p1621_p9 = pneg %p1620_p8 }
  0x41   : > { %1092 = vmatprep.subr.bf16.mxu1 %v1481_v48  ;;  %v1557_v48 = vld [vmem:[%s1698_s22 + $0x324] ss:$8 sps:$4 sm:$0xff]  }
  0x42   : > { %p1628_p13 = pnand %p1627_p12, %p1621_p9 }
  0x43   : > { %1052 = vmatpush2.bf16.msra.mxu0 %v1483_v49  ;;  %v1552_v49 = vld [vmem:[%s1698_s22 + $0x220] ss:$8 sps:$4 sm:$0xff]  }
  0x44   : > { %1093 = vmatpush2.bf16.msra.mxu1 %v1484_v52  ;;  %1053 = vmatprep.subr.bf16.mxu0 %v1485_v53  ;;  %v1560_v52 = vld [vmem:[%s1698_s22 + $0x214] ss:$8 sps:$4 sm:$0xff]  }
  0x45   : > { %1094 = vmatprep.subr.bf16.mxu1 %v1487_v54  ;;  %v1563_v53 = vld [vmem:[%s1698_s22 + $0x314] ss:$8 sps:$4 sm:$0xff]   ;;  %v1558_v54 = vld [vmem:[%s1698_s22 + $0x210] ss:$8 sps:$4 sm:$0xff]  }
  0x47   : > { %1054 = vmatpush2.bf16.msra.mxu0 %v1489_v55  ;;  %v1561_v55 = vld [vmem:[%s1698_s22 + $0x310] ss:$8 sps:$4 sm:$0xff]  }
  0x48   : > { %1095 = vmatpush2.bf16.msra.mxu1 %v1490_v56  ;;  %1055 = vmatprep.subr.bf16.mxu0 %v1491_v58  ;;  %v1566_v56 = vld [vmem:[%s1698_s22 + $0x204] ss:$8 sps:$4 sm:$0xff]   ;;  %v1564_v58 = vld [vmem:[%s1698_s22 + $0x200] ss:$8 sps:$4 sm:$0xff]  }
  0x49   : > { %1096 = vmatprep.subr.bf16.mxu1 %v1493_v59  ;;  %v1567_v59 = vld [vmem:[%s1698_s22 + $0x300] ss:$8 sps:$4 sm:$0xff]  }
  0x4b   : > { %1056 = vmatpush2.bf16.msra.mxu0 %v1495_v61  ;;  %v1575_v61 = vld [vmem:[%s1698_s22 + $0x3f4] ss:$8 sps:$4 sm:$0xff]  }
  0x4c   : > { %1097 = vmatpush2.bf16.msra.mxu1 %v1496_v0  ;;  %1057 = vmatprep.subr.bf16.mxu0 %v1497_v1  ;;  %v1578_v0 = vld [vmem:[%s1698_s22 + $0x2e4] ss:$8 sps:$4 sm:$0xff]  }
  0x4d   : > { %1098 = vmatprep.subr.bf16.mxu1 %v1499_v2  ;;  %v1581_v1 = vld [vmem:[%s1698_s22 + $0x3e4] ss:$8 sps:$4 sm:$0xff]   ;;  %v1576_v2 = vld [vmem:[%s1698_s22 + $0x2e0] ss:$8 sps:$4 sm:$0xff]  }
  0x4f   : > { %1058 = vmatpush2.bf16.msra.mxu0 %v1501_v5  ;;  %v1587_v5 = vld [vmem:[%s1698_s22 + $0x3d4] ss:$8 sps:$4 sm:$0xff]  }
  0x50   : > { %1099 = vmatpush2.bf16.msra.mxu1 %v1502_v8  ;;  %1059 = vmatprep.subr.bf16.mxu0 %v1503_v9  ;;  %v1585_v8 = vld [vmem:[%s1698_s22 + $0x3d0] ss:$8 sps:$4 sm:$0xff]   ;;  %v1590_v9 = vld [vmem:[%s1698_s22 + $0x2c4] ss:$8 sps:$4 sm:$0xff]  }
  0x51   : > { %1100 = vmatprep.subr.bf16.mxu1 %v1505_v10  ;;  %v1593_v10 = vld [vmem:[%s1698_s22 + $0x3c4] ss:$8 sps:$4 sm:$0xff]  }
  0x53   : > { %1060 = vmatpush2.bf16.msra.mxu0 %v1507_v12  ;;  %v1591_v12 = vld [vmem:[%s1698_s22 + $0x3c0] ss:$8 sps:$4 sm:$0xff]  }
  0x54   : > { %1101 = vmatpush2.bf16.msra.mxu1 %v1508_v13  ;;  %1061 = vmatprep.subr.bf16.mxu0 %v1509_v14  ;;  %v1596_v13 = vld [vmem:[%s1698_s22 + $0x2b4] ss:$8 sps:$4 sm:$0xff]  }
  0x55   : > { %1102 = vmatprep.subr.bf16.mxu1 %v1511_v15  ;;  %v1599_v14 = vld [vmem:[%s1698_s22 + $0x3b4] ss:$8 sps:$4 sm:$0xff]   ;;  %v1594_v15 = vld [vmem:[%s1698_s22 + $0x2b0] ss:$8 sps:$4 sm:$0xff]  }
  0x57   : > { %1062 = vmatpush2.bf16.msra.mxu0 %v1513_v16  ;;  %v1597_v16 = vld [vmem:[%s1698_s22 + $0x3b0] ss:$8 sps:$4 sm:$0xff]  }
  0x58   : > { %1103 = vmatpush2.bf16.msra.mxu1 %v1514_v17  ;;  %1063 = vmatprep.subr.bf16.mxu0 %v1515_v18  ;;  %v1602_v17 = vld [vmem:[%s1698_s22 + $0x2a4] ss:$8 sps:$4 sm:$0xff]  }
  0x59   : > { %1104 = vmatprep.subr.bf16.mxu1 %v1517_v19  ;;  %v1605_v18 = vld [vmem:[%s1698_s22 + $0x3a4] ss:$8 sps:$4 sm:$0xff]   ;;  %v1600_v19 = vld [vmem:[%s1698_s22 + $0x2a0] ss:$8 sps:$4 sm:$0xff]  }
  0x5b   : > { %1064 = vmatpush2.bf16.msra.mxu0 %v1519_v21  ;;  %v1608_v21 = vld [vmem:[%s1698_s22 + $0x294] ss:$8 sps:$4 sm:$0xff]  }
  0x5c   : > { %1105 = vmatpush2.bf16.msra.mxu1 %v1520_v23  ;;  %1115 = vmatprep.subr.bf16.mxu0 %v1524_v24  ;;  %v1606_v23 = vld [vmem:[%s1698_s22 + $0x290] ss:$8 sps:$4 sm:$0xff]  }
  0x5d   : > { %1156 = vmatprep.subr.bf16.mxu1 %v1527_v25  ;;  %v1609_v24 = vld [vmem:[%s1698_s22 + $0x390] ss:$8 sps:$4 sm:$0xff]   ;;  %v1614_v25 = vld [vmem:[%s1698_s22 + $0x284] ss:$8 sps:$4 sm:$0xff]  }
  0x5e   : > { %1066 = vmatmul.mubr.bf16.vlgmr.msra.gmra.mxu0 %v359_v22  ;;  %v1611_v22 = vld [vmem:[%s1698_s22 + $0x394] ss:$8 sps:$4 sm:$0xff]  }
  0x5f   : > { %1107 = vmatmul.mubr.bf16.vlgmr.msra.gmra.mxu1 %v381_v27  ;;  %1116 = vmatpush1.bf16.msra.mxu0 %v1522_v28  ;;  %v1612_v27 = vld [vmem:[%s1698_s22 + $0x280] ss:$8 sps:$4 sm:$0xff]  }
  0x60   : > { %1157 = vmatpush1.bf16.msra.mxu1 %v1525_v29  ;;  %1117 = vmatprep.subr.bf16.mxu0 %v1530_v30  ;;  %v1615_v28 = vld [vmem:[%s1698_s22 + $0x380] ss:$8 sps:$4 sm:$0xff]   ;;  %v382_v29 = vcombine.high %v1763_v7, %v1763_v7 }
  0x61   : > { %1158 = vmatprep.subr.bf16.mxu1 %v1533_v31  ;;  %1147 = vmatprep.mubr.bf16.mxu0 %v380_v26  ;;  %v1617_v26 = vld [vmem:[%s1698_s22 + $0x384] ss:$8 sps:$4 sm:$0xff]  }
  0x62   : > { %1188 = vmatprep.mubr.bf16.mxu1 %v384_v32 }
  0x63   : > { %1118 = vmatpush1.bf16.msra.mxu0 %v1528_v33 }
  0x64   : > { %1159 = vmatpush1.bf16.msra.mxu1 %v1531_v34  ;;  %1119 = vmatprep.subr.bf16.mxu0 %v1536_v35 }
  0x65   : > { %1160 = vmatprep.subr.bf16.mxu1 %v1539_v36 }
  0x67   : > { %1120 = vmatpush1.bf16.msra.mxu0 %v1534_v37 }
  0x68   : > { %1161 = vmatpush1.bf16.msra.mxu1 %v1537_v38  ;;  %1121 = vmatprep.subr.bf16.mxu0 %v1542_v39  ;;  %v1655_v39 = vmov 1983009808  }
  0x69   : > { %1162 = vmatprep.subr.bf16.mxu1 %v1545_v40  ;;  %v1201_v40 = vunpack.c.l.s4 %v1655_v39 }
  0x6b   : > { %1122 = vmatpush1.bf16.msra.mxu0 %v1540_v41 }
  0x6c   : > { %1163 = vmatpush1.bf16.msra.mxu1 %v1543_v42  ;;  %1123 = vmatprep.subr.bf16.mxu0 %v1548_v43 }
  0x6d   : > { %1164 = vmatprep.subr.bf16.mxu1 %v1551_v44 }
  0x6f   : > { %1124 = vmatpush1.bf16.msra.mxu0 %v1546_v45  ;;  %v1202_v45 = vunpack.c.0.s8 %v1201_v40 }
  0x70   : > { %1165 = vmatpush1.bf16.msra.mxu1 %v1549_v46  ;;  %1125 = vmatprep.subr.bf16.mxu0 %v1554_v47 }
  0x71   : > { %1166 = vmatprep.subr.bf16.mxu1 %v1557_v48 }
  0x73   : > { %1126 = vmatpush1.bf16.msra.mxu0 %v1552_v49 }
  0x74   : > { %1167 = vmatpush1.bf16.msra.mxu1 %v1555_v50  ;;  %1127 = vmatprep.subr.bf16.mxu0 %v1560_v52 }
  0x75   : > { %1168 = vmatprep.subr.bf16.mxu1 %v1563_v53  ;;  %v1205_v53 = vsub.s32 %v1202_v45, %v1743_v51 }
  0x77   : > { %1128 = vmatpush1.bf16.msra.mxu0 %v1558_v54 }
  0x78   : > { %1169 = vmatpush1.bf16.msra.mxu1 %v1561_v55  ;;  %1129 = vmatprep.subr.bf16.mxu0 %v1566_v56 }
  0x79   : > { %1170 = vmatprep.subr.bf16.mxu1 %v1569_v57  ;;  %v205_v57 = vld [vmem:[#allocation2] sm:$0xf] }
  0x7b   : > { %1130 = vmatpush1.bf16.msra.mxu0 %v1564_v58 }
  0x7c   : > { %1171 = vmatpush1.bf16.msra.mxu1 %v1567_v59  ;;  %1131 = vmatprep.subr.bf16.mxu0 %v1572_v60 }
  0x7d   : > { %1172 = vmatprep.subr.bf16.mxu1 %v1575_v61 }
  0x7f   : > { %1132 = vmatpush2.bf16.msra.mxu0 %v1570_v62 }
  0x80   : > { %1173 = vmatpush2.bf16.msra.mxu1 %v1573_v63  ;;  %1133 = vmatprep.subr.bf16.mxu0 %v1578_v0 }
  0x81   : > { %1174 = vmatprep.subr.bf16.mxu1 %v1581_v1 }
  0x83   : > { %1134 = vmatpush2.bf16.msra.mxu0 %v1576_v2 }
  0x84   : > { %1175 = vmatpush2.bf16.msra.mxu1 %v1579_v3  ;;  %1135 = vmatprep.subr.bf16.mxu0 %v1584_v4 }
  0x85   : > { %1176 = vmatprep.subr.bf16.mxu1 %v1587_v5 }
  0x87   : > { %1136 = vmatpush2.bf16.msra.mxu0 %v1582_v6 }
  0x88   : > { %1177 = vmatpush2.bf16.msra.mxu1 %v1585_v8  ;;  %1137 = vmatprep.subr.bf16.mxu0 %v1590_v9 }
  0x89   : > { %1178 = vmatprep.subr.bf16.mxu1 %v1593_v10 }
  0x8b   : > { %1138 = vmatpush2.bf16.msra.mxu0 %v1588_v11 }
  0x8c   : > { %1179 = vmatpush2.bf16.msra.mxu1 %v1591_v12  ;;  %1139 = vmatprep.subr.bf16.mxu0 %v1596_v13 }
  0x8d   : > { %1180 = vmatprep.subr.bf16.mxu1 %v1599_v14 }
  0x8f   : > { %1140 = vmatpush2.bf16.msra.mxu0 %v1594_v15 }
  0x90   : > { %1181 = vmatpush2.bf16.msra.mxu1 %v1597_v16  ;;  %1141 = vmatprep.subr.bf16.mxu0 %v1602_v17 }
  0x91   : > { %1182 = vmatprep.subr.bf16.mxu1 %v1605_v18 }
  0x93   : > { %1142 = vmatpush2.bf16.msra.mxu0 %v1600_v19 }
  0x94   : > { %1183 = vmatpush2.bf16.msra.mxu1 %v1603_v20  ;;  %1143 = vmatprep.subr.bf16.mxu0 %v1608_v21 }
  0x95   : > { %1184 = vmatprep.subr.bf16.mxu1 %v1611_v22 }
  0x97   : > { %1144 = vmatpush2.bf16.msra.mxu0 %v1606_v23 }
  0x98   : > { %1185 = vmatpush2.bf16.msra.mxu1 %v1609_v24  ;;  %1145 = vmatprep.subr.bf16.mxu0 %v1614_v25 }
  0x99   : > { %1186 = vmatprep.subr.bf16.mxu1 %v1617_v26 }
  0x9b   : > { %1146 = vmatpush2.bf16.msra.mxu0 %v1612_v27 }
  0x9c   : > { %1187 = vmatpush2.bf16.msra.mxu1 %v1615_v28 }
  0x9e   : > { %1148 = vmatmul.mubr.bf16.vlgmr.msra.gmra.mxu0 %v1763_v7 }
  0x9f   : > { %1189 = vmatmul.mubr.bf16.vlgmr.msra.gmra.mxu1 %v382_v29 }
 0x11e   : > { %v1067_v30 = vpop.f32.mrf.mxu0 }
 0x11f   : > { %v1108_v31 = vpop.f32.mrf.mxu1 }
 0x120   : > { %v1109_v32 = vadd.f32 %v1108_v31, %v1067_v30  ;;  %v1069_v33 = vpop.f32.mrf.mxu0 }
 0x121   : > { %v1110_v34 = vpop.f32.mrf.mxu1 }
 0x122   : > { %v1071_v35 = vpop.f32.mrf.mxu0  ;;  %v1111_v43 = vadd.f32 %v1110_v34, %v1069_v33 }
 0x123   : > { %v1112_v36 = vpop.f32.mrf.mxu1 }
 0x124   : > { %v1072_v37 = vpop.f32.mrf.mxu0 }
 0x125   : > { %v1113_v38 = vpop.f32.mrf.mxu1 }
 0x15e   : > { %v1149_v41 = vpop.f32.mrf.mxu0 }
 0x15f   : > { %v1190_v42 = vpop.f32.mrf.mxu1  ;;  %v1150_v44 = vadd.f32 %v1149_v41, %v1109_v32 }
 0x160   : > { %v1151_v46 = vpop.f32.mrf.mxu0 }
 0x161   : > { %v1192_v7 = vpop.f32.mrf.mxu1  ;;  %v1152_v47 = vadd.f32 %v1151_v46, %v1111_v43  ;;  %v1191_v50 = vadd.f32 %v1190_v42, %v1150_v44 }
 0x162   : > { %v1153_v48 = vpop.f32.mrf.mxu0 }
 0x163   : > { %v1194_v49 = vpop.f32.mrf.mxu1  ;;  %v1193_v52 = vadd.f32 %v1192_v7, %v1152_v47 }
 0x164   : > { %v1154_v54 = vpop.f32.mrf.mxu0 }
 0x165   : > { %v1195_v55 = vpop.f32.mrf.mxu1  ;;  %v1199_v56 = vcombine.low %v1191_v50, %v1193_v52 }
 0x167   : > { %v1206_v58 = vrot.slane %v1199_v56, %v1205_v53 }
 0x169   : > { %v1208_v59 = vadd.f32 %v1206_v58, %v205_v57 }
 0x16b   : > { %1209 = vst [vmem:[#allocation2] sm:$0xf] %v1208_v59 }
 0x16c   : > { %1631 = shalt.err (!%p1628_p13)
}
 0x16d   : > { %1409 = dma.vmem_to_hbm [thread:$0]  (%p1412_p6), %s1218_s28, 64, %s1864_s3, [#allocation3]  }
 0x16e   : > { %1647 = dma.done.wait (%p1412_p6), [#allocation3], 64  }
 0x16f   : > { %1649 = vsyncadd (%p1412_p6), [#allocation3], 4294967232 }
 0x170 PF: > { %s14_s12 = sadd.s32 1, %s1652_s12  }
 0x171   : > { %p11_p0 = scmp.ge.s32.totalorder %s14_s12, 6  }
 0x173   :  { %13 = sbr.rel (!%p11_p0) target bundleno = 1 (0x1), region = 66 }
 0x178   :  { %1230 = vsyncpa [#allocation3], 1 }
 0x179   :  { %1232 = vsyncpa [#allocation3 + $0x1], 1 }

</bundles_post_ra>
